<compile_context>
chip_gen: v6e
topology: v6e:2x2x1
jax: 0.10.0
libtpu: 0.0.40
codegen_flags: <defaults>
</compile_context>

<pallas_src>
import functools

import jax
import jax.numpy as jnp
from jax import lax
from jax.experimental import pallas as pl
from jax.experimental.pallas import tpu as pltpu

NEG_SLOPE = 0.01
BN_EPS = 1e-5
LANE = 128


def _conv_bn_lrelu_kernel(x_ref, w_ref, ss_ref, o_ref):
    """One (batch, H-tile) grid step.

    x_ref : (1, 1, TH+2, W+2, Cin)  bf16 overlapped (haloed) input tile
    w_ref : (3, 3, Cin, Cp)         bf16 conv weight (Cout zero-padded to Cp)
    ss_ref: (2, Cp)                 f32  [0]=scale, [1]=shift (bias+BN folded)
    o_ref : (1, TH, W, Cp)          f32 output tile
    """
    TH = o_ref.shape[1]
    W = o_ref.shape[2]
    cp = o_ref.shape[3]
    cin = x_ref.shape[4]

    x = x_ref[0, 0]            # (TH+2, W+2, Cin) bf16
    w = w_ref[...]             # (3, 3, Cin, Cp)  bf16

    acc = jnp.zeros((TH * W, cp), jnp.float32)
    # 3x3 conv as 9 shifted (TH*W, Cin) @ (Cin, Cp) bf16 matmuls, f32 accumulate.
    for kh in range(3):
        xrow = x[kh:kh + TH]                       # hoisted out of the kw loop
        for kw in range(3):
            patch = xrow[:, kw:kw + W, :].reshape(TH * W, cin)
            acc = acc + jnp.dot(patch, w[kh, kw],
                                preferred_element_type=jnp.float32)

    # Dropout2d: identity in eval mode.
    y = acc * ss_ref[0] + ss_ref[1]                # conv bias + BN (eval) folded
    y = jnp.where(y >= 0, y, NEG_SLOPE * y)        # LeakyReLU(0.01)
    o_ref[0] = y.reshape(TH, W, cp).astype(o_ref.dtype)


def _pick_block_h(H, W, Cin, Cp, budget_bytes=12 * 1024 * 1024):
    """Largest H-tile dividing H whose estimated live VMEM fits the budget.

    Budget is conservative so double-buffered tiles stay well under the 32 MiB
    scoped default on v6e/v7x (v7x physical VMEM is only 64 MiB).
    """
    pick = 1
    for th in range(min(H, 128), 0, -1):
        if H % th:
            continue
        in_t = 2 * (th + 2) * (W + 2) * Cin * 2    # bf16 input tile, 2x buffered
        out_t = 2 * th * W * Cp * 4                # f32 output tile, 2x buffered
        acc_t = th * W * Cp * 4                    # f32 accumulator value
        tmp_t = 2 * th * W * Cin * 2               # live bf16 patch temporaries
        if in_t + out_t + acc_t + tmp_t <= budget_bytes:
            pick = th
            break
    return pick


@functools.partial(jax.jit, static_argnames=("block_h",))
def conv_dropout_norm_nonlin(x_nchw, w_hwio, bias, gamma, beta,
                             running_mean, running_var, *, block_h=None):
    """x_nchw: (N, Cin, H, W) f32 -> (N, Cout, H, W) f32 (eval-mode forward)."""
    N, Cin, H, W = x_nchw.shape
    Cout = w_hwio.shape[-1]
    Cp = ((Cout + LANE - 1) // LANE) * LANE        # lane-dense output channels

    TH = block_h if block_h is not None else _pick_block_h(H, W, Cin, Cp)
    assert H % TH == 0, (H, TH)
    nT = H // TH

    # NCHW -> NHWC (channels on the lane axis), cast matmul inputs to bf16,
    # pad spatially by 1 (conv padding=1).
    x_nhwc = jnp.transpose(x_nchw, (0, 2, 3, 1)).astype(jnp.bfloat16)
    x_pad = jnp.pad(x_nhwc, ((0, 0), (1, 1), (1, 1), (0, 0)))
    # Overlapped H-tiles with a 1-row halo on each side: (N, nT, TH+2, W+2, Cin).
    x_tiles = jnp.stack([x_pad[:, t * TH:t * TH + TH + 2] for t in range(nT)],
                        axis=1)

    # Conv weight HWIO, Cout zero-padded to Cp, bf16.
    w_p = jnp.pad(w_hwio, ((0, 0), (0, 0), (0, 0), (0, Cp - Cout))
                  ).astype(jnp.bfloat16)

    # Fold conv bias + eval-mode BatchNorm into one per-channel scale/shift.
    scale = gamma / jnp.sqrt(running_var + BN_EPS)
    shift = beta + (bias - running_mean) * scale
    ss = jnp.stack([jnp.pad(scale, (0, Cp - Cout)),
                    jnp.pad(shift, (0, Cp - Cout))]).astype(jnp.float32)

    Wp = W + 2
    out_nhwc = pl.pallas_call(
        _conv_bn_lrelu_kernel,
        out_shape=jax.ShapeDtypeStruct((N, H, W, Cp), jnp.float32),
        grid_spec=pltpu.PrefetchScalarGridSpec(
            num_scalar_prefetch=0,
            grid=(N, nT),
            in_specs=[
                pl.BlockSpec((1, 1, TH + 2, Wp, Cin),
                             lambda n, t: (n, t, 0, 0, 0)),
                pl.BlockSpec((3, 3, Cin, Cp), lambda n, t: (0, 0, 0, 0)),
                pl.BlockSpec((2, Cp), lambda n, t: (0, 0)),
            ],
            out_specs=pl.BlockSpec((1, TH, W, Cp), lambda n, t: (n, t, 0, 0)),
        ),
        compiler_params=pltpu.CompilerParams(
            dimension_semantics=("parallel", "parallel"),
            vmem_limit_bytes=32 * 1024 * 1024),
    )(x_tiles, w_p, ss)

    # Drop channel padding, NHWC -> NCHW to match the PyTorch module.
    out_nhwc = out_nhwc[:, :, :, :Cout]
    return jnp.transpose(out_nhwc, (0, 3, 1, 2))


def _reference(x_nchw, w_hwio, bias, gamma, beta, running_mean, running_var):
    """Pure-JAX f32 reference (eval-mode forward)."""
    x_nhwc = jnp.transpose(x_nchw, (0, 2, 3, 1))
    y = lax.conv_general_dilated(
        x_nhwc, w_hwio, window_strides=(1, 1), padding=((1, 1), (1, 1)),
        dimension_numbers=("NHWC", "HWIO", "NHWC"))
    y = y + bias
    y = (y - running_mean) / jnp.sqrt(running_var + BN_EPS) * gamma + beta
    y = jnp.where(y >= 0, y, NEG_SLOPE * y)
    return jnp.transpose(y, (0, 3, 1, 2))


if __name__ == "__main__":
    key = jax.random.PRNGKey(0)
    k_x, k_w, k_b, k_g, k_be, k_rm, k_rv = jax.random.split(key, 7)

    N, Cin, H, W = 2, 4, 16, 16
    Cout = 8

    x = jax.random.normal(k_x, (N, Cin, H, W), jnp.float32)
    # Conv2d weight stored HWIO (kh, kw, cin, cout); PyTorch is (cout,cin,kh,kw).
    w = jax.random.normal(k_w, (3, 3, Cin, Cout), jnp.float32) * 0.1
    b = jax.random.normal(k_b, (Cout,), jnp.float32) * 0.1
    gamma = 1.0 + 0.1 * jax.random.normal(k_g, (Cout,), jnp.float32)
    beta = 0.1 * jax.random.normal(k_be, (Cout,), jnp.float32)
    running_mean = 0.1 * jax.random.normal(k_rm, (Cout,), jnp.float32)
    running_var = jnp.abs(1.0 + 0.1 * jax.random.normal(k_rv, (Cout,), jnp.float32))

    ref = _reference(x, w, b, gamma, beta, running_mean, running_var)

    # Explicit H-tiling (block_h=8 -> grid (2, 2)) exercises the halo path.
    out = conv_dropout_norm_nonlin(x, w, b, gamma, beta,
                                   running_mean, running_var, block_h=8)
    out = jax.block_until_ready(out)
    assert out.shape == (N, Cout, H, W), out.shape
    assert jnp.allclose(out, ref, atol=5e-2, rtol=5e-2), \
        float(jnp.max(jnp.abs(out - ref)))

    # Auto-sized tiles (VMEM-budget picker) as well.
    out2 = jax.block_until_ready(
        conv_dropout_norm_nonlin(x, w, b, gamma, beta,
                                 running_mean, running_var))
    assert jnp.allclose(out2, ref, atol=5e-2, rtol=5e-2), \
        float(jnp.max(jnp.abs(out2 - ref)))

    print("KERNEL_OK")
</pallas_src>

<mosaic_0001>
module attributes {stable_mosaic.version = 11 : i64} {
  func.func @_conv_bn_lrelu_kernel(%arg0: i32, %arg1: i32, %arg2: memref<1x1x10x18x4xbf16, #tpu.memory_space<vmem>>, %arg3: memref<3x3x4x128xbf16, #tpu.memory_space<vmem>>, %arg4: memref<2x128xf32, #tpu.memory_space<vmem>>, %arg5: memref<1x8x16x128xf32, #tpu.memory_space<vmem>>) attributes {dimension_semantics = [#tpu.dimension_semantics<parallel>, #tpu.dimension_semantics<parallel>], iteration_bounds = array<i64: 2, 2>, scalar_prefetch = 0 : i64, scratch_operands = 0 : i64, tpu.core_type = #tpu.core_type<tc>, window_params = [{transform_indices = @transform_0, window_bounds = array<i64: 1, 1, 10, 18, 4>}, {pipeline_mode = #tpu.pipeline_mode<synchronous>, transform_indices = @transform_1, window_bounds = array<i64: 3, 3, 4, 128>}, {pipeline_mode = #tpu.pipeline_mode<synchronous>, transform_indices = @transform_2, window_bounds = array<i64: 2, 128>}, {transform_indices = @transform_3, window_bounds = array<i64: 1, 8, 16, 128>}]} {
    %c0 = arith.constant 0 : index
    %c0_0 = arith.constant 0 : index
    %c0_1 = arith.constant 0 : index
    %c0_2 = arith.constant 0 : index
    %c0_3 = arith.constant 0 : index
    %0 = vector.load %arg2[%c0, %c0_0, %c0_1, %c0_2, %c0_3] : memref<1x1x10x18x4xbf16, #tpu.memory_space<vmem>>, vector<1x1x10x18x4xbf16>
    %1 = vector.shape_cast %0 : vector<1x1x10x18x4xbf16> to vector<10x18x4xbf16>
    %c0_4 = arith.constant 0 : index
    %c0_5 = arith.constant 0 : index
    %c0_6 = arith.constant 0 : index
    %c0_7 = arith.constant 0 : index
    %2 = vector.load %arg3[%c0_4, %c0_5, %c0_6, %c0_7] : memref<3x3x4x128xbf16, #tpu.memory_space<vmem>>, vector<3x3x4x128xbf16>
    %cst = arith.constant 0.000000e+00 : f32
    %3 = vector.broadcast %cst : f32 to vector<128x128xf32>
    %4 = vector.extract_strided_slice %1 {offsets = [0, 0, 0], sizes = [8, 18, 4], strides = [1, 1, 1]} : vector<10x18x4xbf16> to vector<8x18x4xbf16>
    %5 = vector.extract_strided_slice %4 {offsets = [0, 0, 0], sizes = [8, 16, 4], strides = [1, 1, 1]} : vector<8x18x4xbf16> to vector<8x16x4xbf16>
    %6 = vector.shape_cast %5 : vector<8x16x4xbf16> to vector<128x4xbf16>
    %7 = vector.extract_strided_slice %2 {offsets = [0, 0, 0, 0], sizes = [1, 1, 4, 128], strides = [1, 1, 1, 1]} : vector<3x3x4x128xbf16> to vector<1x1x4x128xbf16>
    %8 = vector.shape_cast %7 : vector<1x1x4x128xbf16> to vector<4x128xbf16>
    %cst_8 = arith.constant dense<0.000000e+00> : vector<128x128xf32>
    %9 = tpu.matmul %6, %8, %cst_8 {dimension_numbers = #tpu.dot_dimension_numbers<[1], [0], [0], [1], [0, 0, 1, 1], [], []>} : vector<128x4xbf16>, vector<4x128xbf16>, vector<128x128xf32> -> vector<128x128xf32>
    %10 = arith.addf %3, %9 : vector<128x128xf32>
    %11 = vector.extract_strided_slice %4 {offsets = [0, 1, 0], sizes = [8, 16, 4], strides = [1, 1, 1]} : vector<8x18x4xbf16> to vector<8x16x4xbf16>
    %12 = vector.shape_cast %11 : vector<8x16x4xbf16> to vector<128x4xbf16>
    %13 = vector.extract_strided_slice %2 {offsets = [0, 1, 0, 0], sizes = [1, 1, 4, 128], strides = [1, 1, 1, 1]} : vector<3x3x4x128xbf16> to vector<1x1x4x128xbf16>
    %14 = vector.shape_cast %13 : vector<1x1x4x128xbf16> to vector<4x128xbf16>
    %cst_9 = arith.constant dense<0.000000e+00> : vector<128x128xf32>
    %15 = tpu.matmul %12, %14, %cst_9 {dimension_numbers = #tpu.dot_dimension_numbers<[1], [0], [0], [1], [0, 0, 1, 1], [], []>} : vector<128x4xbf16>, vector<4x128xbf16>, vector<128x128xf32> -> vector<128x128xf32>
    %16 = arith.addf %10, %15 : vector<128x128xf32>
    %17 = vector.extract_strided_slice %4 {offsets = [0, 2, 0], sizes = [8, 16, 4], strides = [1, 1, 1]} : vector<8x18x4xbf16> to vector<8x16x4xbf16>
    %18 = vector.shape_cast %17 : vector<8x16x4xbf16> to vector<128x4xbf16>
    %19 = vector.extract_strided_slice %2 {offsets = [0, 2, 0, 0], sizes = [1, 1, 4, 128], strides = [1, 1, 1, 1]} : vector<3x3x4x128xbf16> to vector<1x1x4x128xbf16>
    %20 = vector.shape_cast %19 : vector<1x1x4x128xbf16> to vector<4x128xbf16>
    %cst_10 = arith.constant dense<0.000000e+00> : vector<128x128xf32>
    %21 = tpu.matmul %18, %20, %cst_10 {dimension_numbers = #tpu.dot_dimension_numbers<[1], [0], [0], [1], [0, 0, 1, 1], [], []>} : vector<128x4xbf16>, vector<4x128xbf16>, vector<128x128xf32> -> vector<128x128xf32>
    %22 = arith.addf %16, %21 : vector<128x128xf32>
    %23 = vector.extract_strided_slice %1 {offsets = [1, 0, 0], sizes = [8, 18, 4], strides = [1, 1, 1]} : vector<10x18x4xbf16> to vector<8x18x4xbf16>
    %24 = vector.extract_strided_slice %23 {offsets = [0, 0, 0], sizes = [8, 16, 4], strides = [1, 1, 1]} : vector<8x18x4xbf16> to vector<8x16x4xbf16>
    %25 = vector.shape_cast %24 : vector<8x16x4xbf16> to vector<128x4xbf16>
    %26 = vector.extract_strided_slice %2 {offsets = [1, 0, 0, 0], sizes = [1, 1, 4, 128], strides = [1, 1, 1, 1]} : vector<3x3x4x128xbf16> to vector<1x1x4x128xbf16>
    %27 = vector.shape_cast %26 : vector<1x1x4x128xbf16> to vector<4x128xbf16>
    %cst_11 = arith.constant dense<0.000000e+00> : vector<128x128xf32>
    %28 = tpu.matmul %25, %27, %cst_11 {dimension_numbers = #tpu.dot_dimension_numbers<[1], [0], [0], [1], [0, 0, 1, 1], [], []>} : vector<128x4xbf16>, vector<4x128xbf16>, vector<128x128xf32> -> vector<128x128xf32>
    %29 = arith.addf %22, %28 : vector<128x128xf32>
    %30 = vector.extract_strided_slice %23 {offsets = [0, 1, 0], sizes = [8, 16, 4], strides = [1, 1, 1]} : vector<8x18x4xbf16> to vector<8x16x4xbf16>
    %31 = vector.shape_cast %30 : vector<8x16x4xbf16> to vector<128x4xbf16>
    %32 = vector.extract_strided_slice %2 {offsets = [1, 1, 0, 0], sizes = [1, 1, 4, 128], strides = [1, 1, 1, 1]} : vector<3x3x4x128xbf16> to vector<1x1x4x128xbf16>
    %33 = vector.shape_cast %32 : vector<1x1x4x128xbf16> to vector<4x128xbf16>
    %cst_12 = arith.constant dense<0.000000e+00> : vector<128x128xf32>
    %34 = tpu.matmul %31, %33, %cst_12 {dimension_numbers = #tpu.dot_dimension_numbers<[1], [0], [0], [1], [0, 0, 1, 1], [], []>} : vector<128x4xbf16>, vector<4x128xbf16>, vector<128x128xf32> -> vector<128x128xf32>
    %35 = arith.addf %29, %34 : vector<128x128xf32>
    %36 = vector.extract_strided_slice %23 {offsets = [0, 2, 0], sizes = [8, 16, 4], strides = [1, 1, 1]} : vector<8x18x4xbf16> to vector<8x16x4xbf16>
    %37 = vector.shape_cast %36 : vector<8x16x4xbf16> to vector<128x4xbf16>
    %38 = vector.extract_strided_slice %2 {offsets = [1, 2, 0, 0], sizes = [1, 1, 4, 128], strides = [1, 1, 1, 1]} : vector<3x3x4x128xbf16> to vector<1x1x4x128xbf16>
    %39 = vector.shape_cast %38 : vector<1x1x4x128xbf16> to vector<4x128xbf16>
    %cst_13 = arith.constant dense<0.000000e+00> : vector<128x128xf32>
    %40 = tpu.matmul %37, %39, %cst_13 {dimension_numbers = #tpu.dot_dimension_numbers<[1], [0], [0], [1], [0, 0, 1, 1], [], []>} : vector<128x4xbf16>, vector<4x128xbf16>, vector<128x128xf32> -> vector<128x128xf32>
    %41 = arith.addf %35, %40 : vector<128x128xf32>
    %42 = vector.extract_strided_slice %1 {offsets = [2, 0, 0], sizes = [8, 18, 4], strides = [1, 1, 1]} : vector<10x18x4xbf16> to vector<8x18x4xbf16>
    %43 = vector.extract_strided_slice %42 {offsets = [0, 0, 0], sizes = [8, 16, 4], strides = [1, 1, 1]} : vector<8x18x4xbf16> to vector<8x16x4xbf16>
    %44 = vector.shape_cast %43 : vector<8x16x4xbf16> to vector<128x4xbf16>
    %45 = vector.extract_strided_slice %2 {offsets = [2, 0, 0, 0], sizes = [1, 1, 4, 128], strides = [1, 1, 1, 1]} : vector<3x3x4x128xbf16> to vector<1x1x4x128xbf16>
    %46 = vector.shape_cast %45 : vector<1x1x4x128xbf16> to vector<4x128xbf16>
    %cst_14 = arith.constant dense<0.000000e+00> : vector<128x128xf32>
    %47 = tpu.matmul %44, %46, %cst_14 {dimension_numbers = #tpu.dot_dimension_numbers<[1], [0], [0], [1], [0, 0, 1, 1], [], []>} : vector<128x4xbf16>, vector<4x128xbf16>, vector<128x128xf32> -> vector<128x128xf32>
    %48 = arith.addf %41, %47 : vector<128x128xf32>
    %49 = vector.extract_strided_slice %42 {offsets = [0, 1, 0], sizes = [8, 16, 4], strides = [1, 1, 1]} : vector<8x18x4xbf16> to vector<8x16x4xbf16>
    %50 = vector.shape_cast %49 : vector<8x16x4xbf16> to vector<128x4xbf16>
    %51 = vector.extract_strided_slice %2 {offsets = [2, 1, 0, 0], sizes = [1, 1, 4, 128], strides = [1, 1, 1, 1]} : vector<3x3x4x128xbf16> to vector<1x1x4x128xbf16>
    %52 = vector.shape_cast %51 : vector<1x1x4x128xbf16> to vector<4x128xbf16>
    %cst_15 = arith.constant dense<0.000000e+00> : vector<128x128xf32>
    %53 = tpu.matmul %50, %52, %cst_15 {dimension_numbers = #tpu.dot_dimension_numbers<[1], [0], [0], [1], [0, 0, 1, 1], [], []>} : vector<128x4xbf16>, vector<4x128xbf16>, vector<128x128xf32> -> vector<128x128xf32>
    %54 = arith.addf %48, %53 : vector<128x128xf32>
    %55 = vector.extract_strided_slice %42 {offsets = [0, 2, 0], sizes = [8, 16, 4], strides = [1, 1, 1]} : vector<8x18x4xbf16> to vector<8x16x4xbf16>
    %56 = vector.shape_cast %55 : vector<8x16x4xbf16> to vector<128x4xbf16>
    %57 = vector.extract_strided_slice %2 {offsets = [2, 2, 0, 0], sizes = [1, 1, 4, 128], strides = [1, 1, 1, 1]} : vector<3x3x4x128xbf16> to vector<1x1x4x128xbf16>
    %58 = vector.shape_cast %57 : vector<1x1x4x128xbf16> to vector<4x128xbf16>
    %cst_16 = arith.constant dense<0.000000e+00> : vector<128x128xf32>
    %59 = tpu.matmul %56, %58, %cst_16 {dimension_numbers = #tpu.dot_dimension_numbers<[1], [0], [0], [1], [0, 0, 1, 1], [], []>} : vector<128x4xbf16>, vector<4x128xbf16>, vector<128x128xf32> -> vector<128x128xf32>
    %60 = arith.addf %54, %59 : vector<128x128xf32>
    %c0_17 = arith.constant 0 : index
    %c0_18 = arith.constant 0 : index
    %61 = vector.load %arg4[%c0_17, %c0_18] : memref<2x128xf32, #tpu.memory_space<vmem>>, vector<1x128xf32>
    %62 = vector.shape_cast %61 : vector<1x128xf32> to vector<128xf32>
    %63 = vector.shape_cast %62 : vector<128xf32> to vector<1x128xf32>
    %64 = vector.broadcast %63 : vector<1x128xf32> to vector<128x128xf32>
    %65 = arith.mulf %60, %64 : vector<128x128xf32>
    %c1 = arith.constant 1 : index
    %c0_19 = arith.constant 0 : index
    %66 = vector.load %arg4[%c1, %c0_19] : memref<2x128xf32, #tpu.memory_space<vmem>>, vector<1x128xf32>
    %67 = vector.shape_cast %66 : vector<1x128xf32> to vector<128xf32>
    %68 = vector.shape_cast %67 : vector<128xf32> to vector<1x128xf32>
    %69 = vector.broadcast %68 : vector<1x128xf32> to vector<128x128xf32>
    %70 = arith.addf %65, %69 : vector<128x128xf32>
    %cst_20 = arith.constant 0.000000e+00 : f32
    %71 = vector.broadcast %cst_20 : f32 to vector<128x128xf32>
    %72 = arith.cmpf oge, %70, %71 : vector<128x128xf32>
    %cst_21 = arith.constant 0.00999999977 : f32
    %73 = vector.broadcast %cst_21 : f32 to vector<128x128xf32>
    %74 = arith.mulf %73, %70 : vector<128x128xf32>
    %75 = arith.select %72, %70, %74 : vector<128x128xi1>, vector<128x128xf32>
    %76 = vector.shape_cast %75 : vector<128x128xf32> to vector<8x16x128xf32>
    %c0_22 = arith.constant 0 : index
    %c0_23 = arith.constant 0 : index
    %c0_24 = arith.constant 0 : index
    %c0_25 = arith.constant 0 : index
    %77 = vector.load %arg5[%c0_22, %c0_23, %c0_24, %c0_25] : memref<1x8x16x128xf32, #tpu.memory_space<vmem>>, vector<1x8x16x128xf32>
    %78 = vector.shape_cast %77 : vector<1x8x16x128xf32> to vector<8x16x128xf32>
    %79 = vector.shape_cast %76 : vector<8x16x128xf32> to vector<1x8x16x128xf32>
    tpu.vector_store %arg5[%c0_22, %c0_23, %c0_24, %c0_25], %79 {strides = array<i32>} : memref<1x8x16x128xf32, #tpu.memory_space<vmem>>, vector<1x8x16x128xf32>,
    return
  }
  func.func @transform_0(%arg0: i32, %arg1: i32) -> (i32, i32, i32, i32, i32) {
    %c0_i32 = arith.constant 0 : i32
    %c0_i32_0 = arith.constant 0 : i32
    %c0_i32_1 = arith.constant 0 : i32
    %c0_i32_2 = arith.constant 0 : i32
    return %arg0, %arg1, %c0_i32, %c0_i32_0, %c0_i32_1 : i32, i32, i32, i32, i32
  }
  func.func @transform_1(%arg0: i32, %arg1: i32) -> (i32, i32, i32, i32) {
    %c0_i32 = arith.constant 0 : i32
    %c0_i32_0 = arith.constant 0 : i32
    %c0_i32_1 = arith.constant 0 : i32
    %c0_i32_2 = arith.constant 0 : i32
    %c0_i32_3 = arith.constant 0 : i32
    return %c0_i32, %c0_i32_0, %c0_i32_1, %c0_i32_2 : i32, i32, i32, i32
  }
  func.func @transform_2(%arg0: i32, %arg1: i32) -> (i32, i32) {
    %c0_i32 = arith.constant 0 : i32
    %c0_i32_0 = arith.constant 0 : i32
    %c0_i32_1 = arith.constant 0 : i32
    return %c0_i32, %c0_i32_0 : i32, i32
  }
  func.func @transform_3(%arg0: i32, %arg1: i32) -> (i32, i32, i32, i32) {
    %c0_i32 = arith.constant 0 : i32
    %c0_i32_0 = arith.constant 0 : i32
    %c0_i32_1 = arith.constant 0 : i32
    return %arg0, %arg1, %c0_i32, %c0_i32_0 : i32, i32, i32, i32
  }
}

</mosaic_0001>

<bundles_post_ra>
// kernel: conv_dropout_norm_nonlin.1
= control target key start
LH: loop header
LB: loop body
LE: loop exit
PB: predicated region body
PF: predicated region fallthrough
CT: control target
= control target key end

     0   :  { %s2488_s12 = smov 0   ;;  %s2490_s13 = smov 0   ;;  %s3354_s0 = inlined_call_operand.vmem [shape: bf16[2,2,10,18,4], index: 0, kind: input, shape index: {}]   ;;  %s3355_s1 = inlined_call_operand.vmem [shape: bf16[3,3,4,128], index: 1, kind: input, shape index: {}]   ;;  %s3356_s2 = inlined_call_operand.vmem [shape: f32[2,128], index: 2, kind: input, shape index: {}]   ;;  %s3357_s3 = inlined_call_operand.vmem [shape: f32[2,16,16,128], index: 3, kind: output, shape index: {}]  }
   0x1   :  { %s2492_s14 = smov 0   ;;  %s2494_s15 = smov 0  }
   0x2   :  { %s2496_s16 = smov 0  }
   0x3 LB: > { %s22_s17 = sadd.s32 1, %s2458_s14  ;;  %s25_s18 = sadd.s32 1, %s2462_s15  ;;  %s2466_s16 = sphi %s2496_s16, %s13_s16   ;;  %s2462_s15 = sphi %s2494_s15, %s3406_s15   ;;  %s2458_s14 = sphi %s2492_s14, %s3405_s14   ;;  %s2454_s13 = sphi %s2490_s13, %s3404_s13   ;;  %s2450_s12 = sphi %s2488_s12, %s3403_s12  }
   0x4   : > { %p23_p0 = scmp.ge.s32.totalorder %s22_s17, 2  ;;  %p1999_p1 = scmp.ge.s32.totalorder %s2466_s16, 1 }
   0x5   : > { %p157_p2 = scmp.lt.s32.totalorder %s2466_s16, 5 }
   0x6   : > { %s3408_s17 = smov (%p23_p0, %s22_s17), 0  ;;  %s3410_s18 = smov (!%p23_p0, %s25_s18), %s2462_s15 }
   0x7   : > { %p158_p3 = pnand %p1999_p1, %p157_p2  ;;  %p27_p4 = scmp.ge.s32.totalorder %s3410_s18, 2 }
   0x9   : > { %s3412_s18 = smov (%p27_p4, %s3410_s18), 0  ;;  %161 = sbr.rel (%p158_p3) target bundleno = 405 (0x195), region = 32 }
   0xe   : > { %v242_v0 = vld [vmem:[%s3355_s1 + $0x2] sm:$0x3]  ;;  %vm494_vm0 = vcmask 1041408   ;;  %p190_p5 = scmp.lt.s32.totalorder %s2454_s13, 1  ;;  %p192_p6 = scmp.lt.s32.totalorder %s2450_s12, 1  ;;  %vm469_vm3 = vcmask 31744  }
   0xf   : > { %2367 = vmatprep.subr.msk.bf16.mxu1 %vm494_vm0, %v242_v0  ;;  %2366 = vmatprep.subr.msk.bf16.mxu0 %vm494_vm0, %v242_v0  ;;  %v496_v1 = vsel %vm494_vm0, %v242_v0, 0  ;;  %v241_v2 = vld [vmem:[%s3355_s1] sm:$0x3]  ;;  %v243_v3 = vld [vmem:[%s3355_s1 + $0x4] sm:$0x3]  ;;  %vm767_vm5 = vcmask 1042432  }
  0x10   : > { %2365 = vmatpush3.bf16.msra.mxu1 %v496_v1  ;;  %2203 = vmatpush3.bf16.msra.mxu0 %v496_v1  ;;  %s3414_s13 = smov (!%p190_p5, %s2454_s13), 1  ;;  %vm250_vm1 = vsmask.f32 3328  ;;  %vm251_vm2 = vsmask.f32 7440  ;;  %v2568_v15 = vsel %vm494_vm0, %v241_v2, 0 }
  0x11   : > { %s193_s25 = scalar_select %p192_p6, %s2450_s12, 1  ;;  %2368 = vmatprep.subr.msk.bf16.mxu1 %vm494_vm0, %v241_v2  ;;  %2369 = vmatprep.subr.msk.bf16.mxu0 %vm494_vm0, %v243_v3  ;;  %vm2583_vm4 = vmor %vm250_vm1, %vm251_vm2  ;;  %v2588_v34 = vsel %vm494_vm0, %v243_v3, 0  ;;  %vm768_vm6 = vcmask 1046532  }
  0x12   : > { %s2377_s26 = smul.u32 60, %s3414_s13  ;;  %vm2731_vm7 = vmor %vm767_vm5, %vm768_vm6 }
  0x13   : > { %s2376_s27 = smul.u32 30, %s193_s25  ;;  %s2001_s25 = sshll.u32 %s2450_s12, 3 }
  0x14   : > { %p3182_p7 = scmp.lt.s32.totalorder %s2001_s25, 15 }
  0x15   : > { %s196_s28 = sadd.s32 %s2377_s26, %s2376_s27  ;;  %s2003_s27 = sshll.u32 %s3414_s13, 5 }
  0x16   : > { %s2000_s29 = sshll.u32 %s196_s28, 2  ;;  %s3416_s25 = smov (!%p3182_p7, %s2001_s25), 15 }
  0x17   : > { %s2542_s5 = scalar_lea.vmem %s3354_s0, %s2000_s29  ;;  %s2002_s12 = sshll.u32 %s3416_s25, 1 }
  0x18   : > { %v2545_v4 = vld [vmem:[%s2542_s5] sm:$0xf]  ;;  %v2548_v5 = vld [vmem:[%s2542_s5 + $0x4] sm:$0xf]  ;;  %v2551_v6 = vld [vmem:[%s2542_s5 + $0x8] sm:$0x1]  ;;  %s3246_s29 = sadd.s32 %s2003_s27, %s2002_s12 }
  0x19   : > { %v254_v7 = vshrl.u32 %v2545_v4, 16  ;;  %v257_v8 = vshll.u32 %v2545_v4, 16  ;;  %v263_v9 = vshll.u32 %v2548_v5, 16  ;;  %v267_v10 = vshrl.u32 %v2548_v5, 16  ;;  %v2558_v11 = vld [vmem:[%s2542_s5 + $0x30] sm:$0xf] }
  0x1a   : > { %v273_v12 = vshll.u32 %v2551_v6, 16  ;;  %v2562_v13 = vld [vmem:[%s2542_s5 + $0x34] sm:$0xf]  ;;  %v2565_v14 = vld [vmem:[%s2542_s5 + $0x38] sm:$0x1]  ;;  %v350_v21 = vshrl.u32 %v2558_v11, 16 }
  0x1b   : > { %v256_v16 = vrot.slane %v254_v7, 4  ;;  %v259_v17 = vrot.slane %v257_v8, 5  ;;  %v265_v18 = vrot.slane %v263_v9, 5  ;;  %v269_v19 = vrot.slane %v267_v10, 4  ;;  %v2576_v28 = vld [vmem:[%s2542_s5 + $0xc] sm:$0xf] }
  0x1c   : > { %v275_v20 = vrot.slane %v273_v12, 5  ;;  %v353_v22 = vshll.u32 %v2558_v11, 16  ;;  %v359_v23 = vshll.u32 %v2562_v13, 16  ;;  %v363_v26 = vshrl.u32 %v2562_v13, 16  ;;  %v2579_v29 = vld [vmem:[%s2542_s5 + $0x10] sm:$0xf] }
  0x1d   : > { %v260_v24 = vor.u32 %v259_v17, %v256_v16  ;;  %v270_v25 = vor.u32 %v269_v19, %v265_v18  ;;  %v369_v27 = vshll.u32 %v2565_v14, 16  ;;  %v352_v31 = vrot.slane %v350_v21, 4  ;;  %v2591_v40 = vld [vmem:[%s2542_s5 + $0x14] sm:$0x1]  ;;  %v2602_v52 = vld [vmem:[%s2542_s5 + $0x3c] sm:$0xf] }
  0x1e   : > { %v355_v32 = vrot.slane %v353_v22, 5  ;;  %v361_v33 = vrot.slane %v359_v23, 5  ;;  %v365_v37 = vrot.slane %v363_v26, 4  ;;  %v278_v41 = vshrl.u32 %v2576_v28, 16  ;;  %v2606_v57 = vld [vmem:[%s2542_s5 + $0x40] sm:$0xf] }
  0x1f   : > { %v261_v35 = vrot.slane %v260_v24, 4  ;;  %v271_v36 = vrot.slane %v270_v25, 4  ;;  %v371_v38 = vrot.slane %v369_v27, 5  ;;  %v281_v42 = vshll.u32 %v2576_v28, 16  ;;  %v2614_v62 = vld [vmem:[%s2542_s5 + $0x44] sm:$0x1] }
  0x20   : > { %v356_v39 = vor.u32 %v355_v32, %v352_v31  ;;  %v287_v43 = vshll.u32 %v2579_v29, 16  ;;  %v366_v46 = vor.u32 %v365_v37, %v361_v33  ;;  %v291_v47 = vshrl.u32 %v2579_v29, 16  ;;  %v2620_v3 = vld [vmem:[%s2542_s5 + $0x18] sm:$0xf]  ;;  %v2629_v19 = vld [vmem:[%s2542_s5 + $0x1c] sm:$0xf] }
  0x21   : > { %v266_v44 = vsel %vm2583_vm4, %v261_v35, %v265_v18  ;;  %v276_v45 = vsel %vm2583_vm4, %v271_v36, %v275_v20  ;;  %v280_v50 = vrot.slane %v278_v41, 4  ;;  %v283_v51 = vrot.slane %v281_v42, 5  ;;  %v2636_v23 = vld [vmem:[%s2542_s5 + $0x20] sm:$0x1]  ;;  %v2643_v32 = vld [vmem:[%s2542_s5 + $0x48] sm:$0xf] }
  0x22   : > { %v2005_v48 = vcombine.low %v266_v44, %v276_v45  ;;  %v357_v49 = vrot.slane %v356_v39, 4  ;;  %v367_v53 = vrot.slane %v366_v46, 4  ;;  %v289_v54 = vrot.slane %v287_v43, 5  ;;  %v2656_v44 = vld [vmem:[%s2542_s5 + $0x4c] sm:$0xf] }
  0x23   : > { %v293_v55 = vrot.slane %v291_v47, 4  ;;  %v297_v56 = vshll.u32 %v2591_v40, 16  ;;  %v775_v58 = vrot.slane %v2551_v6, 5  ;;  %v284_v60 = vor.u32 %v283_v51, %v280_v50 }
  0x24   : > { %2204 = vmatprep.mubr.msk.bf16.mxu0 %vm469_vm3, %v2005_v48  ;;  %v362_v59 = vsel %vm2583_vm4, %v357_v49, %v361_v33  ;;  %v779_v61 = vrot.slane %v2579_v29, 5  ;;  %v372_v63 = vsel %vm2583_vm4, %v367_v53, %v371_v38  ;;  %v374_v2 = vshrl.u32 %v2602_v52, 16  ;;  %v2651_v38 = vld [vmem:[%s3355_s1 + $0x8] sm:$0x3] }
  0x25   : > { %v294_v0 = vor.u32 %v293_v55, %v289_v54  ;;  %v299_v1 = vrot.slane %v297_v56, 5  ;;  %v2622_v7 = vcombine.low %v362_v59, %v372_v63  ;;  %v285_v8 = vrot.slane %v284_v60, 4  ;;  %v2670_v63 = vld [vmem:[%s2542_s5 + $0x24] sm:$0xf] }
  0x26   : > { %v377_v9 = vshll.u32 %v2602_v52, 16  ;;  %v383_v10 = vshll.u32 %v2606_v57, 16  ;;  %v376_v16 = vrot.slane %v374_v2, 4  ;;  %v387_v17 = vshrl.u32 %v2606_v57, 16 }
  0x27   : > { %v295_v12 = vrot.slane %v294_v0, 4  ;;  %v393_v18 = vshll.u32 %v2614_v62, 16  ;;  %2212 = vmatprep.mubr.msk.bf16.mxu1 %vm469_vm3, %v2622_v7  ;;  %v290_v20 = vsel %vm2583_vm4, %v285_v8, %v289_v54  ;;  %v302_v24 = vshrl.u32 %v2620_v3, 16  ;;  %v2664_v54 = vld [vmem:[%s2542_s5 + $0x50] sm:$0x1] }
  0x28   : > { %v379_v21 = vrot.slane %v377_v9, 5  ;;  %v385_v22 = vrot.slane %v383_v10, 5  ;;  %v389_v26 = vrot.slane %v387_v17, 4  ;;  %v305_v31 = vshll.u32 %v2620_v3, 16  ;;  %v2678_v8 = vld [vmem:[%s2542_s5 + $0x28] sm:$0xf] }
  0x29   : > { %v300_v25 = vsel %vm2583_vm4, %v295_v12, %v299_v1  ;;  %v395_v27 = vrot.slane %v393_v18, 5  ;;  %v304_v36 = vrot.slane %v302_v24, 4  ;;  %v311_v37 = vshll.u32 %v2629_v19, 16  ;;  %v2686_v17 = vld [vmem:[%s3355_s1 + $0x6] sm:$0x3] }
  0x2a   : > { %v2645_v33 = vcombine.low %v290_v20, %v300_v25  ;;  %v380_v35 = vor.u32 %v379_v21, %v376_v16  ;;  %v390_v39 = vor.u32 %v389_v26, %v385_v22  ;;  %v307_v41 = vrot.slane %v305_v31, 5 }
  0x2b   : > { %v315_v42 = vshrl.u32 %v2629_v19, 16  ;;  %v321_v43 = vshll.u32 %v2636_v23, 16  ;;  %v313_v46 = vrot.slane %v311_v37, 5  ;;  %v398_v47 = vshrl.u32 %v2643_v32, 16 }
  0x2c   : > { %2205 = vmatmul.mubr.msk.bf16.vlgmr.msra.gmra.mxu0 %vm469_vm3, %v2645_v33  ;;  %v381_v45 = vrot.slane %v380_v35, 4  ;;  %v401_v48 = vshll.u32 %v2643_v32, 16  ;;  %v391_v49 = vrot.slane %v390_v39, 4  ;;  %v308_v50 = vor.u32 %v307_v41, %v304_v36  ;;  %v2699_v35 = vld [vmem:[%s2542_s5 + $0x54] sm:$0xf] }
  0x2d   : > { %2239 = vmatpush3.bf16.msra.mxu0 %v2588_v34  ;;  %v317_v51 = vrot.slane %v315_v42, 4  ;;  %v323_v53 = vrot.slane %v321_v43, 5  ;;  %v400_v56 = vrot.slane %v398_v47, 4  ;;  %v407_v60 = vshll.u32 %v2656_v44, 16  ;;  %v2706_v42 = vld [vmem:[%s2542_s5 + $0x58] sm:$0xf] }
  0x2e   : > { %v386_v55 = vsel %vm2583_vm4, %v381_v45, %v385_v22  ;;  %v403_v59 = vrot.slane %v401_v48, 5  ;;  %2371 = vmatprep.subr.msk.bf16.mxu0 %vm494_vm0, %v2651_v38  ;;  %v396_v34 = vsel %vm2583_vm4, %v391_v49, %v395_v27  ;;  %v309_v0 = vrot.slane %v308_v50, 4  ;;  %v2691_v22 = vld [vmem:[%s2542_s5 + $0x2c] sm:$0x1] }
  0x2f   : > { %v318_v1 = vor.u32 %v317_v51, %v313_v46  ;;  %v411_v2 = vshrl.u32 %v2656_v44, 16  ;;  %v2680_v9 = vcombine.low %v386_v55, %v396_v34  ;;  %v409_v12 = vrot.slane %v407_v60, 5 }
  0x30   : > { %v404_v10 = vor.u32 %v403_v59, %v400_v56  ;;  %v417_v16 = vshll.u32 %v2664_v54, 16  ;;  %v314_v18 = vsel %vm2583_vm4, %v309_v0, %v313_v46  ;;  %v326_v24 = vshrl.u32 %v2670_v63, 16 }
  0x31   : > { %v319_v20 = vrot.slane %v318_v1, 4  ;;  %v413_v21 = vrot.slane %v411_v2, 4  ;;  %2213 = vmatmul.mubr.msk.bf16.vlgmr.msra.gmra.mxu1 %vm469_vm3, %v2680_v9  ;;  %v329_v27 = vshll.u32 %v2670_v63, 16  ;;  %v335_v31 = vshll.u32 %v2678_v8, 16 }
  0x32   : > { %v405_v25 = vrot.slane %v404_v10, 4  ;;  %v419_v26 = vrot.slane %v417_v16, 5  ;;  %2221 = vmatpush3.bf16.msra.mxu1 %v2568_v15  ;;  %v328_v39 = vrot.slane %v326_v24, 4  ;;  %v339_v41 = vshrl.u32 %v2678_v8, 16  ;;  %v249_v24 = vld [vmem:[%s3355_s1 + $0x10] sm:$0x3] }
  0x33   : > { %v324_v36 = vsel %vm2583_vm4, %v319_v20, %v323_v53  ;;  %v414_v37 = vor.u32 %v413_v21, %v409_v12  ;;  %v331_v46 = vrot.slane %v329_v27, 5  ;;  %v337_v47 = vrot.slane %v335_v31, 5  ;;  %2370 = vmatprep.subr.msk.bf16.mxu1 %vm494_vm0, %v2686_v17  ;;  %v2719_v53 = vld [vmem:[%s2542_s5 + $0x5c] sm:$0x1] }
  0x34   : > { %v2708_v43 = vcombine.low %v314_v18, %v324_v36  ;;  %v410_v45 = vsel %vm2583_vm4, %v405_v25, %v409_v12  ;;  %v341_v48 = vrot.slane %v339_v41, 4  ;;  %v345_v49 = vshll.u32 %v2691_v22, 16 }
  0x35   : > { %v415_v15 = vrot.slane %v414_v37, 4  ;;  %v422_v50 = vshrl.u32 %v2699_v35, 16  ;;  %v332_v51 = vor.u32 %v331_v46, %v328_v39  ;;  %v425_v55 = vshll.u32 %v2699_v35, 16 }
  0x36   : > { %2208 = vmatprep.mubr.msk.bf16.mxu0 %vm469_vm3, %v2708_v43  ;;  %v431_v56 = vshll.u32 %v2706_v42, 16  ;;  %v435_v59 = vshrl.u32 %v2706_v42, 16  ;;  %v342_v34 = vor.u32 %v341_v48, %v337_v47  ;;  %v347_v0 = vrot.slane %v345_v49, 5 }
  0x37   : > { %v420_v60 = vsel %vm2583_vm4, %v415_v15, %v419_v26  ;;  %v424_v1 = vrot.slane %v422_v50, 4  ;;  %v333_v10 = vrot.slane %v332_v51, 4  ;;  %v427_v12 = vrot.slane %v425_v55, 5 }
  0x38   : > { %v2726_v2 = vcombine.low %v410_v45, %v420_v60  ;;  %v433_v16 = vrot.slane %v431_v56, 5  ;;  %v343_v18 = vrot.slane %v342_v34, 4  ;;  %v437_v20 = vrot.slane %v435_v59, 4 }
  0x39   : > { %v441_v21 = vshll.u32 %v2719_v53, 16  ;;  %v2037_v25 = vrot.slane %v2545_v4, 9  ;;  %v782_v26 = vrot.slane %v2591_v40, 5  ;;  %v338_v27 = vsel %vm2583_vm4, %v333_v10, %v337_v47 }
  0x3a   : > { %2216 = vmatprep.mubr.msk.bf16.mxu1 %vm469_vm3, %v2726_v2  ;;  %v428_v31 = vor.u32 %v427_v12, %v424_v1  ;;  %v772_v36 = vrot.slane %v2548_v5, 5  ;;  %v348_v37 = vsel %vm2583_vm4, %v343_v18, %v347_v0  ;;  %v438_v39 = vor.u32 %v437_v20, %v433_v16 }
  0x3b   : > { %v443_v41 = vrot.slane %v441_v21, 5  ;;  %v2038_v45 = vrot.slane %v2576_v28, 9  ;;  %v2745_v46 = vcombine.low %v338_v27, %v348_v37  ;;  %v2021_v47 = vcombine.low %v2545_v4, %v2548_v5 }
  0x3c   : > { %v429_v15 = vrot.slane %v428_v31, 4  ;;  %v773_v40 = vsel %vm2731_vm7, %v2037_v25, %v772_v36  ;;  %v774_v48 = vrot.slane %v772_v36, 4  ;;  %v439_v49 = vrot.slane %v438_v39, 4 }
  0x3d   : > { %v780_v50 = vsel %vm2731_vm7, %v2038_v45, %v779_v61  ;;  %v781_v51 = vrot.slane %v779_v61, 4  ;;  %2209 = vmatmul.mubr.msk.bf16.gmra.mxu0 %vm469_vm3, %v2745_v46  ;;  %v2039_v4 = vrot.slane %v2620_v3, 9  ;;  %v786_v5 = vrot.slane %v2629_v19, 5 }
  0x3e   : > { %v434_v55 = vsel %vm2583_vm4, %v429_v15, %v433_v16  ;;  %v776_v56 = vsel %vm2731_vm7, %v774_v48, %v775_v58  ;;  %v444_v59 = vsel %vm2583_vm4, %v439_v49, %v443_v41  ;;  %v789_v34 = vrot.slane %v2636_v23, 5 }
  0x3f   : > { %v2045_v60 = vcombine.low %v773_v40, %v776_v56  ;;  %v783_v61 = vsel %vm2731_vm7, %v781_v51, %v782_v26  ;;  %v2772_v0 = vcombine.low %v434_v55, %v444_v59  ;;  %v787_v6 = vsel %vm2731_vm7, %v2039_v4, %v786_v5 }
  0x40   : > { %v788_v1 = vrot.slane %v786_v5, 4  ;;  %v803_v58 = vrot.slane %v2565_v14, 5  ;;  %v2040_v10 = vrot.slane %v2670_v63, 9  ;;  %v793_v12 = vrot.slane %v2678_v8, 5 }
  0x41   : > { %2240 = vmatprep.mubr.msk.bf16.mxu0 %vm469_vm3, %v2045_v60  ;;  %v796_v16 = vrot.slane %v2691_v22, 5  ;;  %2217 = vmatmul.mubr.msk.bf16.gmra.mxu1 %vm469_vm3, %v2772_v0  ;;  %v2783_v23 = vcombine.low %v780_v50, %v783_v61  ;;  %v2041_v20 = vrot.slane %v2558_v11, 9  ;;  %v800_v14 = vrot.slane %v2562_v13, 5 }
  0x42   : > { %v790_v18 = vsel %vm2731_vm7, %v788_v1, %v789_v34  ;;  %2222 = vmatprep.mubr.msk.bf16.mxu1 %vm469_vm3, %v2021_v47  ;;  %v795_v25 = vrot.slane %v793_v12, 4  ;;  %v1145_v22 = vsel %vm494_vm0, %v2651_v38, 0  ;;  %v2042_v27 = vrot.slane %v2602_v52, 9  ;;  %v2808_v38 = vld [vmem:[%s3355_s1 + $0xc] sm:$0x3] }
  0x43   : > { %v2790_v21 = vcombine.low %v787_v6, %v790_v18  ;;  %v802_v26 = vrot.slane %v800_v14, 4  ;;  %v807_v31 = vrot.slane %v2606_v57, 5  ;;  %v2798_v36 = vcombine.low %v2576_v28, %v2579_v29  ;;  %v2828_v47 = vld [vmem:[%s2542_s5 + $0x60] sm:$0xf] }
  0x44   : > { %v794_v37 = vsel %vm2731_vm7, %v2040_v10, %v793_v12  ;;  %v797_v39 = vsel %vm2731_vm7, %v795_v25, %v796_v16  ;;  %v810_v41 = vrot.slane %v2614_v62, 5  ;;  %v801_v28 = vsel %vm2731_vm7, %v2041_v20, %v800_v14  ;;  %v2881_v25 = vld [vmem:[%s2542_s5 + $0x6c] sm:$0xf] }
  0x45   : > { %2241 = vmatmul.mubr.msk.bf16.vlgmr.msra.gmra.mxu0 %vm469_vm3, %v2783_v23  ;;  %v804_v29 = vsel %vm2731_vm7, %v802_v26, %v803_v58  ;;  %v809_v45 = vrot.slane %v807_v31, 4  ;;  %v2043_v15 = vrot.slane %v2643_v32, 9  ;;  %v999_v62 = vsel %vm494_vm0, %v2686_v17, 0 }
  0x46   : > { %2275 = vmatpush3.bf16.msra.mxu0 %v1145_v22  ;;  %v2821_v40 = vcombine.low %v2620_v3, %v2629_v19  ;;  %2244 = vmatprep.mubr.msk.bf16.mxu0 %vm469_vm3, %v2790_v21  ;;  %v814_v48 = vrot.slane %v2656_v44, 5  ;;  %v817_v49 = vrot.slane %v2664_v54, 5  ;;  %v2832_v50 = vcombine.low %v2670_v63, %v2678_v8  ;;  %v2845_v19 = vld [vmem:[%s2542_s5 + $0x64] sm:$0xf]  ;;  %v237_v54 = vld [vmem:[%s2542_s5 + $0x68] sm:$0x1] }
  0x47   : > { %v2834_v51 = vcombine.low %v794_v37, %v797_v39  ;;  %v2838_v17 = vcombine.low %v2558_v11, %v2562_v13  ;;  %v808_v3 = vsel %vm2731_vm7, %v2042_v27, %v807_v31  ;;  %2373 = vmatprep.subr.msk.bf16.mxu0 %vm494_vm0, %v2808_v38  ;;  %v2848_v55 = vcombine.low %v801_v28, %v804_v29  ;;  %v2856_v11 = vld [vmem:[%s3355_s1 + $0xa] sm:$0x3]  ;;  %v2888_v31 = vld [vmem:[%s2542_s5 + $0x70] sm:$0xf]  ;;  %v240_v29 = vld [vmem:[%s2542_s5 + $0x74] sm:$0x1] }
  0x48   : > { %v811_v63 = vsel %vm2731_vm7, %v809_v45, %v810_v41  ;;  %v816_v8 = vrot.slane %v814_v48, 4  ;;  %v821_v56 = vrot.slane %v2706_v42, 5  ;;  %v815_v13 = vsel %vm2731_vm7, %v2043_v15, %v814_v48  ;;  %s2004_s5 = sshll.u32 %s3246_s29, 3 }
  0x49   : > { %2223 = vmatmul.mubr.msk.bf16.vlgmr.msra.gmra.mxu1 %vm469_vm3, %v2798_v36  ;;  %v2044_v4 = vrot.slane %v2699_v35, 9  ;;  %v1115_v5 = vshrl.u32 %v2828_v47, 16  ;;  %v1118_v59 = vshll.u32 %v2828_v47, 16  ;;  %v1128_v61 = vshrl.u32 %v2845_v19, 16  ;;  %s3275_s8 = scalar_lea.vmem %s3357_s3, %s2004_s5 }
  0x4a   : > { %2257 = vmatpush3.bf16.msra.mxu1 %v999_v62  ;;  %2226 = vmatprep.mubr.msk.bf16.mxu1 %vm469_vm3, %v2821_v40  ;;  %v818_v60 = vsel %vm2731_vm7, %v816_v8, %v817_v49  ;;  %v1124_v34 = vshll.u32 %v2845_v19, 16  ;;  %v1134_v6 = vshll.u32 %v237_v54, 16  ;;  %v2871_v1 = vcombine.low %v808_v3, %v811_v63 }
  0x4b   : > { %v824_v58 = vrot.slane %v2719_v53, 5  ;;  %2372 = vmatprep.subr.msk.bf16.mxu1 %vm494_vm0, %v2856_v11  ;;  %v1117_v10 = vrot.slane %v1115_v5, 4  ;;  %v1120_v12 = vrot.slane %v1118_v59, 5  ;;  %v2876_v16 = vcombine.low %v815_v13, %v818_v60 }
  0x4c   : > { %v823_v18 = vrot.slane %v821_v56, 4  ;;  %v1126_v20 = vrot.slane %v1124_v34, 5  ;;  %v1130_v14 = vrot.slane %v1128_v61, 4  ;;  %v2079_v53 = vrot.slane %v2828_v47, 9 }
  0x4d   : > { %2245 = vmatmul.mubr.msk.bf16.gmra.mxu0 %vm469_vm3, %v2834_v51  ;;  %v1121_v22 = vor.u32 %v1120_v12, %v1117_v10  ;;  %v1263_v26 = vrot.slane %v2845_v19, 5  ;;  %v1266_v27 = vrot.slane %v237_v54, 5  ;;  %v1136_v39 = vrot.slane %v1134_v6, 5 }
  0x4e   : > { %2248 = vmatprep.mubr.msk.bf16.mxu0 %vm469_vm3, %v2848_v55  ;;  %v1131_v37 = vor.u32 %v1130_v14, %v1126_v20  ;;  %v1515_v41 = vshrl.u32 %v2881_v25, 16  ;;  %v1518_v28 = vshll.u32 %v2881_v25, 16  ;;  %v1528_v48 = vshrl.u32 %v2888_v31, 16 }
  0x4f   : > { %v1122_v45 = vrot.slane %v1121_v22, 4  ;;  %v1264_v15 = vsel %vm2731_vm7, %v2079_v53, %v1263_v26  ;;  %v1265_v62 = vrot.slane %v1263_v26, 4  ;;  %v1524_v63 = vshll.u32 %v2888_v31, 16 }
  0x50   : > { %v1132_v49 = vrot.slane %v1131_v37, 4  ;;  %v1517_v3 = vrot.slane %v1515_v41, 4  ;;  %v1520_v54 = vrot.slane %v1518_v28, 5  ;;  %v1530_v5 = vrot.slane %v1528_v48, 4 }
  0x51   : > { %2227 = vmatmul.mubr.msk.bf16.gmra.mxu1 %vm469_vm3, %v2832_v50  ;;  %v1127_v8 = vsel %vm2583_vm4, %v1122_v45, %v1126_v20  ;;  %v1267_v13 = vsel %vm2731_vm7, %v1265_v62, %v1266_v27  ;;  %v1534_v59 = vshll.u32 %v240_v29, 16  ;;  %v1526_v6 = vrot.slane %v1524_v63, 5 }
  0x52   : > { %2230 = vmatprep.mubr.msk.bf16.mxu1 %vm469_vm3, %v2838_v17  ;;  %v1137_v60 = vsel %vm2583_vm4, %v1132_v49, %v1136_v39  ;;  %v2909_v61 = vcombine.low %v1264_v15, %v1267_v13  ;;  %v1521_v34 = vor.u32 %v1520_v54, %v1517_v3  ;;  %v2107_v12 = vrot.slane %v2881_v25, 9 }
  0x53   : > { %v2911_v10 = vcombine.low %v1127_v8, %v1137_v60  ;;  %v1663_v20 = vrot.slane %v2888_v31, 5  ;;  %v1531_v22 = vor.u32 %v1530_v5, %v1526_v6  ;;  %v1536_v53 = vrot.slane %v1534_v59, 5 }
  0x54   : > { %v1522_v14 = vrot.slane %v1521_v34, 4  ;;  %v1666_v26 = vrot.slane %v240_v29, 5  ;;  %v2026_v27 = vcombine.low %v2602_v52, %v2606_v57  ;;  %v2027_v37 = vcombine.low %v2643_v32, %v2656_v44 }
  0x55   : > { %2249 = vmatmul.mubr.msk.bf16.gmra.mxu0 %vm469_vm3, %v2871_v1  ;;  %v2923_v39 = vsel %vm2731_vm7, %v2107_v12, %v1663_v20  ;;  %v1665_v41 = vrot.slane %v1663_v20, 4  ;;  %v822_v52 = vsel %vm2731_vm7, %v2044_v4, %v821_v56  ;;  %v825_v57 = vsel %vm2731_vm7, %v823_v18, %v824_v58 }
  0x56   : > { %2252 = vmatprep.mubr.msk.bf16.mxu0 %vm469_vm3, %v2876_v16  ;;  %v1527_v32 = vsel %vm2583_vm4, %v1522_v14, %v1526_v6  ;;  %v1532_v44 = vrot.slane %v1531_v22, 4  ;;  %v2052_v56 = vcombine.low %v822_v52, %v825_v57  ;;  %v2028_v58 = vcombine.low %v2699_v35, %v2706_v42  ;;  %v248_v35 = vld [vmem:[%s3355_s1 + $0xe] sm:$0x3] }
  0x57   : > { %v2939_v28 = vsel %vm2731_vm7, %v1665_v41, %v1666_v26  ;;  %v1399_v30 = vsel %vm494_vm0, %v2808_v38, 0  ;;  %v2061_v42 = vcombine.low %v2828_v47, %v2845_v19  ;;  %v1545_v38 = vsel %vm494_vm0, %v248_v35, 0 }
  0x58   : > { %v1537_v29 = vsel %vm2583_vm4, %v1532_v44, %v1536_v53  ;;  %v2108_v45 = vcombine.low %v2923_v39, %v2939_v28 }
  0x59   : > { %2231 = vmatmul.mubr.msk.bf16.gmra.mxu1 %vm469_vm3, %v2026_v27  ;;  %v2946_v4 = vcombine.low %v1527_v32, %v1537_v29 }
  0x5a   : > { %2234 = vmatprep.mubr.msk.bf16.mxu1 %vm469_vm3, %v2027_v37 }
  0x5d   : > { %2253 = vmatmul.mubr.msk.bf16.gmra.mxu0 %vm469_vm3, %v2052_v56 }
  0x5e   : > { %2276 = vmatprep.mubr.msk.bf16.mxu0 %vm469_vm3, %v2645_v33  ;;  %v1275_v33 = vsel %vm494_vm0, %v2856_v11, 0 }
  0x61   : > { %2235 = vmatmul.mubr.msk.bf16.gmra.mxu1 %vm469_vm3, %v2028_v58 }
  0x62   : > { %2258 = vmatprep.mubr.msk.bf16.mxu1 %vm469_vm3, %v2798_v36  ;;  %v1675_v36 = vsel %vm494_vm0, %v249_v24, 0 }
  0x65   : > { %2277 = vmatmul.mubr.msk.bf16.vlgmr.msra.gmra.mxu0 %vm469_vm3, %v2708_v43 }
  0x66   : > { %2311 = vmatpush3.bf16.msra.mxu0 %v1399_v30  ;;  %2280 = vmatprep.mubr.msk.bf16.mxu0 %vm469_vm3, %v2745_v46 }
  0x67   : > { %2375 = vmatprep.subr.msk.bf16.mxu0 %vm494_vm0, %v249_v24 }
  0x69   : > { %2259 = vmatmul.mubr.msk.bf16.vlgmr.msra.gmra.mxu1 %vm469_vm3, %v2821_v40 }
  0x6a   : > { %2293 = vmatpush3.bf16.msra.mxu1 %v1275_v33  ;;  %2262 = vmatprep.mubr.msk.bf16.mxu1 %vm469_vm3, %v2832_v50 }
  0x6b   : > { %2374 = vmatprep.subr.msk.bf16.mxu1 %vm494_vm0, %v248_v35 }
  0x6d   : > { %2281 = vmatmul.mubr.msk.bf16.gmra.mxu0 %vm469_vm3, %v2622_v7 }
  0x6e   : > { %2284 = vmatprep.mubr.msk.bf16.mxu0 %vm469_vm3, %v2680_v9 }
  0x71   : > { %2263 = vmatmul.mubr.msk.bf16.gmra.mxu1 %vm469_vm3, %v2838_v17 }
  0x72   : > { %2266 = vmatprep.mubr.msk.bf16.mxu1 %vm469_vm3, %v2026_v27 }
  0x75   : > { %2285 = vmatmul.mubr.msk.bf16.gmra.mxu0 %vm469_vm3, %v2726_v2 }
  0x76   : > { %2288 = vmatprep.mubr.msk.bf16.mxu0 %vm469_vm3, %v2772_v0 }
  0x79   : > { %2267 = vmatmul.mubr.msk.bf16.gmra.mxu1 %vm469_vm3, %v2027_v37 }
  0x7a   : > { %2270 = vmatprep.mubr.msk.bf16.mxu1 %vm469_vm3, %v2028_v58 }
  0x7d   : > { %2289 = vmatmul.mubr.msk.bf16.gmra.mxu0 %vm469_vm3, %v2911_v10 }
  0x7e   : > { %2312 = vmatprep.mubr.msk.bf16.mxu0 %vm469_vm3, %v2821_v40 }
  0x81   : > { %2271 = vmatmul.mubr.msk.bf16.gmra.mxu1 %vm469_vm3, %v2061_v42 }
  0x82   : > { %2294 = vmatprep.mubr.msk.bf16.mxu1 %vm469_vm3, %v2783_v23  ;;  %v2089_v23 = vcombine.low %v2881_v25, %v2888_v31 }
  0x85   : > { %2313 = vmatmul.mubr.msk.bf16.vlgmr.msra.gmra.mxu0 %vm469_vm3, %v2832_v50 }
  0x86   : > { %2347 = vmatpush3.bf16.msra.mxu0 %v1675_v36  ;;  %2316 = vmatprep.mubr.msk.bf16.mxu0 %vm469_vm3, %v2838_v17 }
  0x89   : > { %2295 = vmatmul.mubr.msk.bf16.vlgmr.msra.gmra.mxu1 %vm469_vm3, %v2790_v21 }
  0x8a   : > { %2329 = vmatpush3.bf16.msra.mxu1 %v1545_v38  ;;  %2298 = vmatprep.mubr.msk.bf16.mxu1 %vm469_vm3, %v2834_v51 }
  0x8d   : > { %2317 = vmatmul.mubr.msk.bf16.gmra.mxu0 %vm469_vm3, %v2026_v27 }
  0x8e   : > { %2320 = vmatprep.mubr.msk.bf16.mxu0 %vm469_vm3, %v2027_v37 }
  0x91   : > { %2299 = vmatmul.mubr.msk.bf16.gmra.mxu1 %vm469_vm3, %v2848_v55 }
  0x92   : > { %2302 = vmatprep.mubr.msk.bf16.mxu1 %vm469_vm3, %v2871_v1 }
  0x95   : > { %2321 = vmatmul.mubr.msk.bf16.gmra.mxu0 %vm469_vm3, %v2028_v58 }
  0x96   : > { %2324 = vmatprep.mubr.msk.bf16.mxu0 %vm469_vm3, %v2061_v42 }
  0x99   : > { %2303 = vmatmul.mubr.msk.bf16.gmra.mxu1 %vm469_vm3, %v2876_v16 }
  0x9a   : > { %2306 = vmatprep.mubr.msk.bf16.mxu1 %vm469_vm3, %v2052_v56 }
  0x9d   : > { %2325 = vmatmul.mubr.msk.bf16.gmra.mxu0 %vm469_vm3, %v2089_v23 }
  0x9e   : > { %2348 = vmatprep.mubr.msk.bf16.mxu0 %vm469_vm3, %v2790_v21 }
  0xa1   : > { %2307 = vmatmul.mubr.msk.bf16.gmra.mxu1 %vm469_vm3, %v2909_v61 }
  0xa2   : > { %2330 = vmatprep.mubr.msk.bf16.mxu1 %vm469_vm3, %v2708_v43 }
  0xa5   : > { %2349 = vmatmul.mubr.msk.bf16.vlgmr.msra.gmra.mxu0 %vm469_vm3, %v2834_v51 }
  0xa6   : > { %2352 = vmatprep.mubr.msk.bf16.mxu0 %vm469_vm3, %v2848_v55 }
  0xa9   : > { %2331 = vmatmul.mubr.msk.bf16.vlgmr.msra.gmra.mxu1 %vm469_vm3, %v2745_v46 }
  0xaa   : > { %2334 = vmatprep.mubr.msk.bf16.mxu1 %vm469_vm3, %v2622_v7 }
  0xad   : > { %2353 = vmatmul.mubr.msk.bf16.gmra.mxu0 %vm469_vm3, %v2871_v1 }
  0xae   : > { %2356 = vmatprep.mubr.msk.bf16.mxu0 %vm469_vm3, %v2876_v16 }
  0xb1   : > { %2335 = vmatmul.mubr.msk.bf16.gmra.mxu1 %vm469_vm3, %v2680_v9 }
  0xb2   : > { %2338 = vmatprep.mubr.msk.bf16.mxu1 %vm469_vm3, %v2726_v2 }
  0xb5   : > { %2357 = vmatmul.mubr.msk.bf16.gmra.mxu0 %vm469_vm3, %v2052_v56 }
  0xb6   : > { %2360 = vmatprep.mubr.msk.bf16.mxu0 %vm469_vm3, %v2909_v61 }
  0xb9   : > { %2339 = vmatmul.mubr.msk.bf16.gmra.mxu1 %vm469_vm3, %v2772_v0 }
  0xba   : > { %2342 = vmatprep.mubr.msk.bf16.mxu1 %vm469_vm3, %v2911_v10 }
  0xbd   : > { %2361 = vmatmul.mubr.msk.bf16.gmra.mxu0 %vm469_vm3, %v2108_v45 }
  0xc1   : > { %2343 = vmatmul.mubr.msk.bf16.gmra.mxu1 %vm469_vm3, %v2946_v4 }
  0xec   : > { %v2206_v7 = vpop.f32.mrf.mxu0 }
  0xee   : > { %v532_v43 = vpop.f32.mrf.mxu0 }
  0xf0   : > { %v2207_v46 = vpop.f32.mrf.mxu0 }
  0xf1   : > { %v2214_v9 = vpop.f32.mrf.mxu1 }
  0xf2   : > { %v535_v40 = vpop.f32.mrf.mxu0 }
  0xf3   : > { %v564_v2 = vpop.f32.mrf.mxu1 }
  0xf5   : > { %v2215_v21 = vpop.f32.mrf.mxu1 }
  0xf7   : > { %v567_v47 = vpop.f32.mrf.mxu1 }
  0xfd   : > { %v2210_v0 = vpop.f32.mrf.mxu0 }
  0xff   : > { %v548_v50 = vpop.f32.mrf.mxu0 }
 0x101   : > { %v2218_v51 = vpop.f32.mrf.mxu1  ;;  %v2211_v17 = vpop.f32.mrf.mxu0 }
 0x103   : > { %v580_v19 = vpop.f32.mrf.mxu1  ;;  %v551_v55 = vpop.f32.mrf.mxu0 }
 0x105   : > { %v2219_v11 = vpop.f32.mrf.mxu1  ;;  %v2242_v1 = vpop.f32.mrf.mxu0 }
 0x107   : > { %v3058_v16 = vpop.f32.mrf.mxu1  ;;  %v911_v18 = vpop.f32.mrf.mxu0 }
 0x109   : > { %v2224_v25 = vpop.f32.mrf.mxu1  ;;  %v2243_v31 = vpop.f32.mrf.mxu0 }
 0x10a   : > { %v705_v15 = vadd.f32 %v2224_v25, %v2206_v7 }
 0x10b   : > { %v696_v62 = vpop.f32.mrf.mxu1  ;;  %v914_v48 = vpop.f32.mrf.mxu0 }
 0x10c   : > { %v3060_v49 = vadd.f32 %v2242_v1, %v705_v15  ;;  %v697_v3 = vadd.f32 %v696_v62, %v532_v43 }
 0x10d   : > { %v2225_v54 = vpop.f32.mrf.mxu1  ;;  %v2246_v63 = vpop.f32.mrf.mxu0 }
 0x10e   : > { %v3062_v8 = vadd.f32 %v911_v18, %v697_v3  ;;  %v708_v13 = vadd.f32 %v2225_v54, %v2207_v46 }
 0x10f   : > { %v699_v5 = vpop.f32.mrf.mxu1  ;;  %v927_v59 = vpop.f32.mrf.mxu0 }
 0x110   : > { %v3064_v60 = vadd.f32 %v2243_v31, %v708_v13  ;;  %v700_v61 = vadd.f32 %v699_v5, %v535_v40 }
 0x111   : > { %v2228_v34 = vpop.f32.mrf.mxu1  ;;  %v2247_v6 = vpop.f32.mrf.mxu0 }
 0x112   : > { %v3066_v10 = vadd.f32 %v914_v48, %v700_v61  ;;  %v721_v12 = vadd.f32 %v2228_v34, %v2210_v0 }
 0x113   : > { %v712_v20 = vpop.f32.mrf.mxu1  ;;  %v930_v14 = vpop.f32.mrf.mxu0 }
 0x114   : > { %v3068_v22 = vadd.f32 %v2246_v63, %v721_v12  ;;  %v713_v53 = vadd.f32 %v712_v20, %v548_v50 }
 0x115   : > { %v2229_v26 = vpop.f32.mrf.mxu1  ;;  %v2250_v27 = vpop.f32.mrf.mxu0 }
 0x116   : > { %v3070_v37 = vadd.f32 %v927_v59, %v713_v53  ;;  %v724_v39 = vadd.f32 %v2229_v26, %v2211_v17 }
 0x117   : > { %v715_v41 = vpop.f32.mrf.mxu1  ;;  %v943_v52 = vpop.f32.mrf.mxu0 }
 0x118   : > { %v3072_v57 = vadd.f32 %v2247_v6, %v724_v39  ;;  %v716_v32 = vadd.f32 %v715_v41, %v551_v55 }
 0x119   : > { %v2232_v44 = vpop.f32.mrf.mxu1  ;;  %v2251_v28 = vpop.f32.mrf.mxu0 }
 0x11a   : > { %v3074_v29 = vadd.f32 %v930_v14, %v716_v32  ;;  %v737_v45 = vadd.f32 %v2232_v44, %v2214_v9 }
 0x11b   : > { %v728_v56 = vpop.f32.mrf.mxu1  ;;  %v946_v4 = vpop.f32.mrf.mxu0 }
 0x11c   : > { %v3076_v58 = vadd.f32 %v2250_v27, %v737_v45  ;;  %v729_v30 = vadd.f32 %v728_v56, %v564_v2 }
 0x11d   : > { %v2233_v24 = vpop.f32.mrf.mxu1  ;;  %v2254_v33 = vpop.f32.mrf.mxu0 }
 0x11e   : > { %v3078_v35 = vadd.f32 %v943_v52, %v729_v30  ;;  %v740_v42 = vadd.f32 %v2233_v24, %v2215_v21 }
 0x11f   : > { %v731_v36 = vpop.f32.mrf.mxu1  ;;  %v959_v38 = vpop.f32.mrf.mxu0 }
 0x120   : > { %v3080_v23 = vadd.f32 %v2251_v28, %v740_v42  ;;  %v732_v7 = vadd.f32 %v731_v36, %v567_v47 }
 0x121   : > { %v2236_v43 = vpop.f32.mrf.mxu1  ;;  %v2255_v46 = vpop.f32.mrf.mxu0 }
 0x122   : > { %v3082_v40 = vadd.f32 %v946_v4, %v732_v7  ;;  %v753_v9 = vadd.f32 %v2236_v43, %v2218_v51 }
 0x123   : > { %v744_v0 = vpop.f32.mrf.mxu1  ;;  %v962_v50 = vpop.f32.mrf.mxu0 }
 0x124   : > { %v3084_v17 = vadd.f32 %v2254_v33, %v753_v9  ;;  %v745_v2 = vadd.f32 %v744_v0, %v580_v19 }
 0x125   : > { %v2237_v55 = vpop.f32.mrf.mxu1  ;;  %v3086_v1 = vpop.f32.mrf.mxu0 }
 0x126   : > { %v3088_v18 = vadd.f32 %v959_v38, %v745_v2  ;;  %v756_v21 = vadd.f32 %v2237_v55, %v2219_v11 }
 0x127   : > { %v747_v25 = vpop.f32.mrf.mxu1  ;;  %v3090_v31 = vpop.f32.mrf.mxu0 }
 0x128   : > { %v3092_v47 = vadd.f32 %v2255_v46, %v756_v21  ;;  %v748_v15 = vadd.f32 %v747_v25, %v3058_v16 }
 0x129   : > { %v2260_v62 = vpop.f32.mrf.mxu1  ;;  %v3095_v51 = vpop.f32.mrf.mxu0 }
 0x12a   : > { %v3097_v48 = vadd.f32 %v962_v50, %v748_v15 }
 0x12b   : > { %v1035_v3 = vpop.f32.mrf.mxu1  ;;  %v3099_v19 = vpop.f32.mrf.mxu0 }
 0x12d   : > { %v2261_v54 = vpop.f32.mrf.mxu1  ;;  %v3101_v63 = vpop.f32.mrf.mxu0 }
 0x12f   : > { %v1038_v13 = vpop.f32.mrf.mxu1  ;;  %v3103_v11 = vpop.f32.mrf.mxu0 }
 0x131   : > { %v2264_v5 = vpop.f32.mrf.mxu1  ;;  %v3105_v59 = vpop.f32.mrf.mxu0 }
 0x133   : > { %v1051_v61 = vpop.f32.mrf.mxu1  ;;  %v3107_v34 = vpop.f32.mrf.mxu0 }
 0x135   : > { %v2265_v16 = vpop.f32.mrf.mxu1  ;;  %v3109_v6 = vpop.f32.mrf.mxu0 }
 0x137   : > { %v1054_v12 = vpop.f32.mrf.mxu1  ;;  %v3111_v20 = vpop.f32.mrf.mxu0 }
 0x139   : > { %v2268_v14 = vpop.f32.mrf.mxu1  ;;  %v3113_v53 = vpop.f32.mrf.mxu0 }
 0x13b   : > { %v1067_v26 = vpop.f32.mrf.mxu1  ;;  %v3115_v27 = vpop.f32.mrf.mxu0 }
 0x13d   : > { %v2269_v39 = vpop.f32.mrf.mxu1  ;;  %v3117_v41 = vpop.f32.mrf.mxu0 }
 0x13f   : > { %v1070_v52 = vpop.f32.mrf.mxu1  ;;  %v3119_v32 = vpop.f32.mrf.mxu0 }
 0x141   : > { %v2272_v44 = vpop.f32.mrf.mxu1  ;;  %v3121_v28 = vpop.f32.mrf.mxu0 }
 0x142   : > { %3362 = vst [vmem:[#allocation2_spill] sm:$0xff] %v3121_v28 }
 0x143   : > { %v1083_v45 = vpop.f32.mrf.mxu1  ;;  %v3123_v56 = vpop.f32.mrf.mxu0 }
 0x144   : > { %3363 = vst [vmem:[#allocation3_spill] sm:$0xff] %v3123_v56 }
 0x145   : > { %v3125_v4 = vpop.f32.mrf.mxu1  ;;  %v3127_v30 = vpop.f32.mrf.mxu0 }
 0x147   : > { %v3129_v24 = vpop.f32.mrf.mxu1  ;;  %v3131_v33 = vpop.f32.mrf.mxu0 }
 0x149   : > { %v2296_v42 = vpop.f32.mrf.mxu1  ;;  %v3133_v36 = vpop.f32.mrf.mxu0 }
 0x14a   : > { %3364 = vst [vmem:[#allocation4_spill] sm:$0xff] %v3133_v36 }
 0x14b   : > { %v1311_v38 = vpop.f32.mrf.mxu1  ;;  %v3135_v7 = vpop.f32.mrf.mxu0 }
 0x14c   : > { %3365 = vst [vmem:[#allocation5_spill] sm:$0xff] %v3135_v7 }
 0x14d   : > { %v2297_v43 = vpop.f32.mrf.mxu1  ;;  %v3137_v46 = vpop.f32.mrf.mxu0 }
 0x14e   : > { %3366 = vst [vmem:[#allocation6_spill] sm:$0xff] %v3137_v46 }
 0x14f   : > { %v3139_v9 = vpop.f32.mrf.mxu1  ;;  %v3141_v0 = vpop.f32.mrf.mxu0 }
 0x150   : > { %3367 = vst [vmem:[#allocation7_spill] sm:$0xff] %v3141_v0 }
 0x151   : > { %v3143_v50 = vpop.f32.mrf.mxu1  ;;  %v3145_v2 = vpop.f32.mrf.mxu0 }
 0x152   : > { %3368 = vst [vmem:[#allocation8_spill] sm:$0xff] %v3145_v2 }
 0x153   : > { %v3147_v55 = vpop.f32.mrf.mxu1  ;;  %v3149_v21 = vpop.f32.mrf.mxu0 }
 0x154   : > { %3369 = vst [vmem:[#allocation9_spill] sm:$0xff] %v3147_v55  ;;  %3370 = vst [vmem:[#allocation10_spill] sm:$0xff] %v3149_v21  ;;  %v1100_v21 = vadd.f32 %v2260_v62, %v3060_v49  ;;  %v1101_v49 = vadd.f32 %v2261_v54, %v3064_v60  ;;  %v1099_v62 = vadd.f32 %v1038_v13, %v3066_v10 }
 0x155   : > { %v3151_v25 = vpop.f32.mrf.mxu1  ;;  %v3153_v15 = vpop.f32.mrf.mxu0  ;;  %v1106_v60 = vadd.f32 %v1067_v26, %v3078_v35  ;;  %v1109_v10 = vadd.f32 %v2269_v39, %v3080_v23 }
 0x156   : > { %3371 = vst [vmem:[#allocation11_spill] sm:$0xff] %v3153_v15  ;;  %v1247_v54 = vadd.f32 %v3095_v51, %v1101_v49 }
 0x157   : > { %v3155_v56 = vpop.f32.mrf.mxu1  ;;  %v3157_v46 = vpop.f32.mrf.mxu0 }
 0x158   : > { %3372 = vst [vmem:[#allocation12_spill] sm:$0xff] %v3155_v56  ;;  %3373 = vst [vmem:[#allocation13_spill] sm:$0xff] %v3157_v46  ;;  %v1098_v46 = vadd.f32 %v1035_v3, %v3062_v8  ;;  %v1105_v8 = vadd.f32 %v2265_v16, %v3072_v57  ;;  %v1377_v16 = vadd.f32 %v2297_v43, %v1247_v54 }
 0x159   : > { %v3159_v7 = vpop.f32.mrf.mxu1  ;;  %v3161_v0 = vpop.f32.mrf.mxu0 }
 0x15a   : > { %3374 = vst [vmem:[#allocation14_spill] sm:$0xff] %v3159_v7  ;;  %3375 = vst [vmem:[#allocation15_spill] sm:$0xff] %v3161_v0  ;;  %v1251_v23 = vadd.f32 %v3105_v59, %v1105_v8 }
 0x15b   : > { %v3163_v36 = vpop.f32.mrf.mxu1  ;;  %v3165_v28 = vpop.f32.mrf.mxu0 }
 0x15c   : > { %3376 = vst [vmem:[#allocation16_spill] sm:$0xff] %v3165_v28  ;;  %v1246_v28 = vadd.f32 %v3086_v1, %v1100_v21  ;;  %v1108_v21 = vadd.f32 %v2268_v14, %v3076_v58 }
 0x15d   : > { %v3167_v2 = vpop.f32.mrf.mxu1  ;;  %v3169_v55 = vpop.f32.mrf.mxu0 }
 0x15e   : > { %3377 = vst [vmem:[#allocation17_spill] sm:$0xff] %v3169_v55  ;;  %v1104_v55 = vadd.f32 %v2264_v5, %v3068_v22  ;;  %v1376_v1 = vadd.f32 %v2296_v42, %v1246_v28  ;;  %v1107_v22 = vadd.f32 %v1070_v52, %v3082_v40  ;;  %v1110_v40 = vadd.f32 %v1083_v45, %v3088_v18  ;;  %v3384_v45 = vld [vmem:[#allocation2_spill] sm:$0xff] }
 0x15f   : > { %v3173_v15 = vpop.f32.mrf.mxu1  ;;  %v3175_v56 = vpop.f32.mrf.mxu0 }
 0x160   : > { %3378 = vst [vmem:[#allocation18_spill] sm:$0xff] %v3173_v15  ;;  %3379 = vst [vmem:[#allocation19_spill] sm:$0xff] %v3175_v56  ;;  %v1102_v56 = vadd.f32 %v1051_v61, %v3070_v37  ;;  %v1103_v15 = vadd.f32 %v1054_v12, %v3074_v29  ;;  %v1112_v29 = vadd.f32 %v2272_v44, %v3084_v17  ;;  %v3240_v44 = vld [vmem:[%s3356_s2] ss:$0 sm:$0xff] }
 0x161   : > { %v3178_v7 = vpop.f32.mrf.mxu1  ;;  %v3180_v0 = vpop.f32.mrf.mxu0  ;;  %v1250_v58 = vadd.f32 %v3101_v63, %v1104_v55  ;;  %v1500_v17 = vadd.f32 %v3127_v30, %v1376_v1  ;;  %v1254_v63 = vadd.f32 %v3109_v6, %v1108_v21  ;;  %v1252_v12 = vadd.f32 %v3111_v20, %v1106_v60  ;;  %v3388_v55 = vld [vmem:[#allocation5_spill] sm:$0xff]  ;;  %v3390_v21 = vld [vmem:[#allocation6_spill] sm:$0xff] }
 0x162   : > { %3380 = vst [vmem:[#allocation20_spill] sm:$0xff] %v3178_v7  ;;  %3381 = vst [vmem:[#allocation21_spill] sm:$0xff] %v3180_v0  ;;  %v1244_v7 = vadd.f32 %v3090_v31, %v1098_v46  ;;  %v1245_v31 = vadd.f32 %v3099_v19, %v1099_v62  ;;  %v1248_v35 = vadd.f32 %v3103_v11, %v1102_v56  ;;  %v3255_v46 = vld [vmem:[%s3356_s2 + $0x1] ss:$0 sm:$0xff] }
 0x163   : > { %v3192_v3 = vpop.f32.mrf.mxu1  ;;  %v3194_v0 = vpop.f32.mrf.mxu0  ;;  %v1249_v51 = vadd.f32 %v3107_v34, %v1103_v15  ;;  %v1113_v19 = vadd.f32 %v3125_v4, %v3092_v47  ;;  %v1255_v11 = vadd.f32 %v3113_v53, %v1109_v10  ;;  %v1253_v59 = vadd.f32 %v3115_v27, %v1107_v22  ;;  %v3383_v53 = vld [vmem:[#allocation9_spill] sm:$0xff]  ;;  %v3385_v4 = vld [vmem:[#allocation4_spill] sm:$0xff]  ;;  %v3391_v10 = vld [vmem:[#allocation7_spill] sm:$0xff] }
 0x164   : > { %v1374_v13 = vadd.f32 %v1311_v38, %v1244_v7  ;;  %v1258_v34 = vadd.f32 %v3117_v41, %v1112_v29  ;;  %v1375_v47 = vadd.f32 %v3139_v9, %v1245_v31  ;;  %v3231_v52 = vadd.f32 %v3119_v32, %v1110_v40  ;;  %v3387_v38 = vld [vmem:[#allocation14_spill] sm:$0xff] }
 0x165   : > { %v3202_v37 = vpop.f32.mrf.mxu1  ;;  %v2350_v57 = vpop.f32.mrf.mxu0  ;;  %v1111_v6 = vadd.f32 %v3129_v24, %v3097_v48  ;;  %v1380_v20 = vadd.f32 %v3143_v50, %v1250_v58  ;;  %v1378_v27 = vadd.f32 %v3383_v53, %v1248_v35  ;;  %v3243_v56 = vadd.f32 %v3384_v45, %v1113_v19  ;;  %v3392_v35 = vld [vmem:[#allocation8_spill] sm:$0xff]  ;;  %v3393_v40 = vld [vmem:[#allocation10_spill] sm:$0xff] }
 0x166   : > { %v1498_v26 = vadd.f32 %v3131_v33, %v1374_v13  ;;  %v1501_v32 = vadd.f32 %v3385_v4, %v1377_v16  ;;  %v1381_v24 = vadd.f32 %v3151_v25, %v1251_v23  ;;  %v3386_v33 = vld [vmem:[#allocation12_spill] sm:$0xff]  ;;  %v1384_v7 = vadd.f32 %v3387_v38, %v1254_v63  ;;  %v3389_v25 = vld [vmem:[#allocation3_spill] sm:$0xff] }
 0x167   : > { %v3215_v5 = vpop.f32.mrf.mxu1  ;;  %v1711_v61 = vpop.f32.mrf.mxu0  ;;  %v1379_v42 = vadd.f32 %v3386_v33, %v1249_v51  ;;  %v1382_v43 = vadd.f32 %v3163_v36, %v1252_v12  ;;  %v1499_v15 = vadd.f32 %v3388_v55, %v1375_v47  ;;  %v3260_v1 = vadd.f32 %v3389_v25, %v1111_v6  ;;  %v3394_v51 = vld [vmem:[#allocation11_spill] sm:$0xff]  ;;  %v3397_v47 = vld [vmem:[#allocation18_spill] sm:$0xff] }
 0x168   : > { %v1504_v60 = vadd.f32 %v3390_v21, %v1380_v20  ;;  %v1502_v36 = vadd.f32 %v3391_v10, %v1378_v27  ;;  %v1385_v22 = vadd.f32 %v3167_v2, %v1255_v11  ;;  %v1505_v23 = vadd.f32 %v3392_v35, %v1381_v24 }
 0x169   : > { %v2332_v18 = vpop.f32.mrf.mxu1  ;;  %v2351_v14 = vpop.f32.mrf.mxu0  ;;  %v1508_v19 = vadd.f32 %v3394_v51, %v1384_v7 }
 0x16a   : > { %v1646_v39 = vadd.f32 %v2332_v18, %v1500_v17  ;;  %v3395_v17 = vld [vmem:[#allocation13_spill] sm:$0xff] }
 0x16b   : > { %v1581_v41 = vpop.f32.mrf.mxu1  ;;  %v1714_v28 = vpop.f32.mrf.mxu0  ;;  %v1506_v16 = vadd.f32 %v3395_v17, %v1382_v43  ;;  %v3399_v43 = vld [vmem:[#allocation16_spill] sm:$0xff] }
 0x16c   : > { %v1776_v30 = vadd.f32 %v2350_v57, %v1646_v39  ;;  %v1644_v48 = vadd.f32 %v1581_v41, %v1498_v26  ;;  %v1383_v39 = vadd.f32 %v3397_v47, %v1253_v59 }
 0x16d   : > { %v2333_v9 = vpop.f32.mrf.mxu1  ;;  %v2354_v50 = vpop.f32.mrf.mxu0 }
 0x16e   : > { %v1797_v49 = vmul.f32 %v3240_v44, %v1776_v30  ;;  %v1774_v62 = vadd.f32 %v1711_v61, %v1644_v48  ;;  %v1647_v8 = vadd.f32 %v2333_v9, %v1501_v32  ;;  %v1503_v61 = vadd.f32 %v3393_v40, %v1379_v42  ;;  %v3398_v32 = vld [vmem:[#allocation20_spill] sm:$0xff] }
 0x16f   : > { %v1584_v57 = vpop.f32.mrf.mxu1  ;;  %v1727_v54 = vpop.f32.mrf.mxu0  ;;  %v1388_v30 = vadd.f32 %v3398_v32, %v1258_v34  ;;  %v1507_v9 = vadd.f32 %v3399_v43, %v1383_v39 }
 0x170   : > { %v1818_v31 = vadd.f32 %v3255_v46, %v1797_v49  ;;  %v1795_v29 = vmul.f32 %v3240_v44, %v1774_v62  ;;  %v1777_v13 = vadd.f32 %v2351_v14, %v1647_v8  ;;  %v1645_v58 = vadd.f32 %v1584_v57, %v1499_v15  ;;  %v3396_v14 = vld [vmem:[#allocation15_spill] sm:$0xff] }
 0x171   : > { %v2336_v63 = vpop.f32.mrf.mxu1  ;;  %v2355_v12 = vpop.f32.mrf.mxu0  ;;  %v3280_v26 = vadd.f32 %v3396_v14, %v1385_v22 }
 0x172   : > { %vm1834_vm8 = vcmp.ge.f32.partialorder %v1818_v31, 0.0  ;;  %v1850_v2 = vmul.f32 0.01, %v1818_v31  ;;  %v1816_v11 = vadd.f32 %v3255_v46, %v1795_v29  ;;  %v1798_v18 = vmul.f32 %v3240_v44, %v1777_v13 }
 0x173   : > { %v1775_v6 = vadd.f32 %v1714_v28, %v1645_v58  ;;  %v1650_v20 = vadd.f32 %v2336_v63, %v1504_v60  ;;  %v1597_v53 = vpop.f32.mrf.mxu1  ;;  %v1730_v27 = vpop.f32.mrf.mxu0 }
 0x174   : > { %v1866_v41 = vsel %vm1834_vm8, %v1818_v31, %v1850_v2  ;;  %vm1832_vm9 = vcmp.ge.f32.partialorder %v1816_v11, 0.0  ;;  %v1848_v45 = vmul.f32 0.01, %v1816_v11  ;;  %v1819_v4 = vadd.f32 %v3255_v46, %v1798_v18  ;;  %v3400_v31 = vld [vmem:[#allocation17_spill] sm:$0xff] }
 0x175   : > { %1882 = vst [vmem:[%s3275_s8 + $0x10] sm:$0xff] %v1866_v41  ;;  %v1796_v48 = vmul.f32 %v3240_v44, %v1775_v6  ;;  %v1780_v24 = vadd.f32 %v2354_v50, %v1650_v20  ;;  %v1648_v33 = vadd.f32 %v1597_v53, %v1502_v36  ;;  %v2337_v42 = vpop.f32.mrf.mxu1  ;;  %v2358_v38 = vpop.f32.mrf.mxu0  ;;  %v1386_v50 = vadd.f32 %v3192_v3, %v3231_v52 }
 0x176   : > { %v1864_v59 = vsel %vm1832_vm9, %v1816_v11, %v1848_v45  ;;  %vm1835_vm10 = vcmp.ge.f32.partialorder %v1819_v4, 0.0  ;;  %v1851_v28 = vmul.f32 0.01, %v1819_v4  ;;  %v1651_v7 = vadd.f32 %v2337_v42, %v1505_v23 }
 0x177   : > { %1880 = vst [vmem:[%s3275_s8] sm:$0xff] %v1864_v59  ;;  %v1817_v55 = vadd.f32 %v3255_v46, %v1796_v48  ;;  %v1801_v15 = vmul.f32 %v3240_v44, %v1780_v24  ;;  %v1778_v34 = vadd.f32 %v1727_v54, %v1648_v33  ;;  %v1600_v49 = vpop.f32.mrf.mxu1  ;;  %v1743_v62 = vpop.f32.mrf.mxu0  ;;  %v1512_v54 = vadd.f32 %v3400_v31, %v1388_v30 }
 0x178   : > { %v1867_v8 = vsel %vm1835_vm10, %v1819_v4, %v1851_v28  ;;  %v1781_v25 = vadd.f32 %v2355_v12, %v1651_v7  ;;  %v1649_v21 = vadd.f32 %v1600_v49, %v1503_v61  ;;  %v3401_v12 = vld [vmem:[#allocation19_spill] sm:$0xff]  ;;  %v1389_v20 = vadd.f32 %v3202_v37, %v3243_v56 }
 0x179   : > { %1883 = vst [vmem:[%s3275_s8 + $0x18] sm:$0xff] %v1867_v8  ;;  %vm1833_vm11 = vcmp.ge.f32.partialorder %v1817_v55, 0.0  ;;  %v1849_v60 = vmul.f32 0.01, %v1817_v55  ;;  %v1822_v10 = vadd.f32 %v3255_v46, %v1801_v15  ;;  %v1799_v36 = vmul.f32 %v3240_v44, %v1778_v34  ;;  %v2340_v22 = vpop.f32.mrf.mxu1  ;;  %v2359_v57 = vpop.f32.mrf.mxu0 }
 0x17a   : > { %v1802_v29 = vmul.f32 %v3240_v44, %v1781_v25  ;;  %v1779_v13 = vadd.f32 %v1730_v27, %v1649_v21  ;;  %v1654_v58 = vadd.f32 %v2340_v22, %v1508_v19  ;;  %v1510_v2 = vadd.f32 %v3401_v12, %v1386_v50 }
 0x17b   : > { %v1865_v3 = vsel %vm1833_vm11, %v1817_v55, %v1849_v60  ;;  %vm1838_vm12 = vcmp.ge.f32.partialorder %v1822_v10, 0.0  ;;  %v1854_v52 = vmul.f32 0.01, %v1822_v10  ;;  %v1820_v35 = vadd.f32 %v3255_v46, %v1799_v36  ;;  %v1613_v23 = vpop.f32.mrf.mxu1  ;;  %v1746_v40 = vpop.f32.mrf.mxu0 }
 0x17c   : > { %1881 = vst [vmem:[%s3275_s8 + $0x8] sm:$0xff] %v1865_v3  ;;  %v1823_v61 = vadd.f32 %v3255_v46, %v1802_v29  ;;  %v1800_v51 = vmul.f32 %v3240_v44, %v1779_v13  ;;  %v1784_v17 = vadd.f32 %v2358_v38, %v1654_v58  ;;  %v1652_v63 = vadd.f32 %v1613_v23, %v1506_v16 }
 0x17d   : > { %v1870_v11 = vsel %vm1838_vm12, %v1822_v10, %v1854_v52  ;;  %vm1836_vm13 = vcmp.ge.f32.partialorder %v1820_v35, 0.0  ;;  %v1852_v19 = vmul.f32 0.01, %v1820_v35  ;;  %v2341_v18 = vpop.f32.mrf.mxu1  ;;  %v2362_v6 = vpop.f32.mrf.mxu0  ;;  %v1387_v30 = vadd.f32 %v3215_v5, %v3260_v1  ;;  %v3402_v5 = vld [vmem:[#allocation21_spill] sm:$0xff] }
 0x17e   : > { %1886 = vst [vmem:[%s3275_s8 + $0x30] sm:$0xff] %v1870_v11  ;;  %vm1839_vm14 = vcmp.ge.f32.partialorder %v1823_v61, 0.0  ;;  %v1855_v14 = vmul.f32 0.01, %v1823_v61  ;;  %v1821_v47 = vadd.f32 %v3255_v46, %v1800_v51  ;;  %v1805_v39 = vmul.f32 %v3240_v44, %v1784_v17 }
 0x17f   : > { %v1868_v16 = vsel %vm1836_vm13, %v1820_v35, %v1852_v19  ;;  %v1782_v53 = vadd.f32 %v1743_v62, %v1652_v63  ;;  %v1655_v27 = vadd.f32 %v2341_v18, %v3280_v26  ;;  %v1616_v41 = vpop.f32.mrf.mxu1  ;;  %v1759_v38 = vpop.f32.mrf.mxu0  ;;  %v1513_v1 = vadd.f32 %v3402_v5, %v1389_v20 }
 0x180   : > { %1884 = vst [vmem:[%s3275_s8 + $0x20] sm:$0xff] %v1868_v16  ;;  %v1871_v45 = vsel %vm1839_vm14, %v1823_v61, %v1855_v14  ;;  %vm1837_vm15 = vcmp.ge.f32.partialorder %v1821_v47, 0.0  ;;  %v1853_v4 = vmul.f32 0.01, %v1821_v47  ;;  %v1826_v32 = vadd.f32 %v3255_v46, %v1805_v39 }
 0x181   : > { %1887 = vst [vmem:[%s3275_s8 + $0x38] sm:$0xff] %v1871_v45  ;;  %v1803_v48 = vmul.f32 %v3240_v44, %v1782_v53  ;;  %v1785_v24 = vadd.f32 %v2359_v57, %v1655_v27  ;;  %v1653_v37 = vadd.f32 %v1616_v41, %v1507_v9  ;;  %v2344_v56 = vpop.f32.mrf.mxu1  ;;  %v1511_v8 = vadd.f32 %v3194_v0, %v1387_v30  ;;  %v2363_v10 = vpop.f32.mrf.mxu0 }
 0x182   : > { %v1869_v33 = vsel %vm1837_vm15, %v1821_v47, %v1853_v4  ;;  %vm1842_vm0 = vcmp.ge.f32.partialorder %v1826_v32, 0.0  ;;  %v1858_v26 = vmul.f32 0.01, %v1826_v32  ;;  %v1658_v42 = vadd.f32 %v2344_v56, %v1512_v54 }
 0x183   : > { %1885 = vst [vmem:[%s3275_s8 + $0x28] sm:$0xff] %v1869_v33  ;;  %v1824_v59 = vadd.f32 %v3255_v46, %v1803_v48  ;;  %v1806_v28 = vmul.f32 %v3240_v44, %v1785_v24  ;;  %v1783_v7 = vadd.f32 %v1746_v40, %v1653_v37  ;;  %v1629_v43 = vpop.f32.mrf.mxu1  ;;  %v1762_v40 = vpop.f32.mrf.mxu0 }
 0x184   : > { %v1874_v55 = vsel %vm1842_vm0, %v1826_v32, %v1858_v26  ;;  %v1788_v15 = vadd.f32 %v2362_v6, %v1658_v42  ;;  %v1656_v34 = vadd.f32 %v1629_v43, %v1510_v2 }
 0x185   : > { %1890 = vst [vmem:[%s3275_s8 + $0x50] sm:$0xff] %v1874_v55  ;;  %vm1840_vm1 = vcmp.ge.f32.partialorder %v1824_v59, 0.0  ;;  %v1856_v9 = vmul.f32 0.01, %v1824_v59  ;;  %v1827_v49 = vadd.f32 %v3255_v46, %v1806_v28  ;;  %v1804_v62 = vmul.f32 %v3240_v44, %v1783_v7  ;;  %v2345_v50 = vpop.f32.mrf.mxu1 }
 0x186   : > { %v1809_v25 = vmul.f32 %v3240_v44, %v1788_v15  ;;  %v1786_v21 = vadd.f32 %v1759_v38, %v1656_v34  ;;  %v1659_v60 = vadd.f32 %v2345_v50, %v1513_v1 }
 0x187   : > { %v1872_v36 = vsel %vm1840_vm1, %v1824_v59, %v1856_v9  ;;  %vm1843_vm2 = vcmp.ge.f32.partialorder %v1827_v49, 0.0  ;;  %v1859_v22 = vmul.f32 0.01, %v1827_v49  ;;  %v1825_v57 = vadd.f32 %v3255_v46, %v1804_v62  ;;  %v1632_v31 = vpop.f32.mrf.mxu1 }
 0x188   : > { %1888 = vst [vmem:[%s3275_s8 + $0x40] sm:$0xff] %v1872_v36  ;;  %v1830_v54 = vadd.f32 %v3255_v46, %v1809_v25  ;;  %v1807_v29 = vmul.f32 %v3240_v44, %v1786_v21  ;;  %v1789_v13 = vadd.f32 %v2363_v10, %v1659_v60  ;;  %v1657_v0 = vadd.f32 %v1632_v31, %v1511_v8 }
 0x189   : > { %v1875_v58 = vsel %vm1843_vm2, %v1827_v49, %v1859_v22  ;;  %vm1841_vm3 = vcmp.ge.f32.partialorder %v1825_v57, 0.0  ;;  %v1857_v3 = vmul.f32 0.01, %v1825_v57 }
 0x18a   : > { %1891 = vst [vmem:[%s3275_s8 + $0x58] sm:$0xff] %v1875_v58  ;;  %vm1846_vm4 = vcmp.ge.f32.partialorder %v1830_v54, 0.0  ;;  %v1862_v52 = vmul.f32 0.01, %v1830_v54  ;;  %v1828_v35 = vadd.f32 %v3255_v46, %v1807_v29  ;;  %v1810_v23 = vmul.f32 %v3240_v44, %v1789_v13 }
 0x18b   : > { %v1873_v61 = vsel %vm1841_vm3, %v1825_v57, %v1857_v3  ;;  %v1787_v51 = vadd.f32 %v1762_v40, %v1657_v0 }
 0x18c   : > { %1889 = vst [vmem:[%s3275_s8 + $0x48] sm:$0xff] %v1873_v61  ;;  %v1878_v17 = vsel %vm1846_vm4, %v1830_v54, %v1862_v52  ;;  %vm1844_vm5 = vcmp.ge.f32.partialorder %v1828_v35, 0.0  ;;  %v1860_v63 = vmul.f32 0.01, %v1828_v35  ;;  %v1831_v12 = vadd.f32 %v3255_v46, %v1810_v23 }
 0x18d   : > { %1894 = vst [vmem:[%s3275_s8 + $0x70] sm:$0xff] %v1878_v17  ;;  %v1808_v2 = vmul.f32 %v3240_v44, %v1787_v51 }
 0x18e   : > { %v1876_v11 = vsel %vm1844_vm5, %v1828_v35, %v1860_v63  ;;  %vm1847_vm6 = vcmp.ge.f32.partialorder %v1831_v12, 0.0  ;;  %v1863_v19 = vmul.f32 0.01, %v1831_v12 }
 0x18f   : > { %1892 = vst [vmem:[%s3275_s8 + $0x60] sm:$0xff] %v1876_v11  ;;  %v1829_v18 = vadd.f32 %v3255_v46, %v1808_v2 }
 0x190   : > { %v1879_v14 = vsel %vm1847_vm6, %v1831_v12, %v1863_v19 }
 0x191   : > { %1895 = vst [vmem:[%s3275_s8 + $0x78] sm:$0xff] %v1879_v14  ;;  %vm1845_vm7 = vcmp.ge.f32.partialorder %v1829_v18, 0.0  ;;  %v1861_v47 = vmul.f32 0.01, %v1829_v18 }
 0x193   : > { %v1877_v39 = vsel %vm1845_vm7, %v1829_v18, %v1861_v47 }
 0x194   : > { %1893 = vst [vmem:[%s3275_s8 + $0x68] sm:$0xff] %v1877_v39 }
 0x195 PF: > { %s13_s16 = sadd.s32 1, %s2466_s16   ;;  %s3403_s12 = smov %s2458_s14 }
 0x196   : > { %p10_p8 = scmp.ge.s32.totalorder %s13_s16, 6   ;;  %s3404_s13 = smov %s2462_s15 }
 0x197   : > { %s3405_s14 = smov %s3408_s17  ;;  %s3406_s15 = smov %s3412_s18 }
 0x198   :  { %12 = sbr.rel (!%p10_p8) target bundleno = 3 (0x3), region = 62 }

</bundles_post_ra>
